<compile_context>
chip_gen: v7x
topology: tpu7x:2x2x1
jax: 0.10.0
libtpu: 0.0.40
codegen_flags: <defaults>
</compile_context>

<pallas_src>
import functools

import jax
import jax.numpy as jnp
from jax import lax
from jax.experimental import pallas as pl
from jax.experimental.pallas import tpu as pltpu


# ---------------------------------------------------------------------------
# Fused Pallas kernel: all LSTM layers + fused heads (one batch chunk)
# ---------------------------------------------------------------------------
def _fused_lstm_heads_kernel(*refs, n_layers, seq_len, batch_block, hidden,
                             mxu_dtype):
    """refs = [x, (wih, whh, b) * n_layers, w_heads, b_heads,   # inputs
               out,                                             # output
               gproj, hstates]                                  # scratch

    x:        (T, Bb, D_in)    time-major batch chunk (Bb % 8 == 0)
    wih_l:    (D_in or H, 4H)  pre-transposed, gate order i, f, g, o;
                               g columns pre-scaled by 2 (tanh-via-sigmoid)
    whh_l:    (H, 4H)          g columns pre-scaled by 2
    b_l:      (1, 4H)          b_ih + b_hh, g entries pre-scaled by 2
    w_heads:  (H, n_out)       [fc_1 | fc_2 | fc_3], un-padded
    b_heads:  (1, n_out)
    out:      (T, Bb, n_out)
    gproj:    (T*Bb, 4H) scr   hoisted input projection of the current layer
    hstates:  (T*Bb, H)  scr   current layer's hidden states for all timesteps
    """
    idx = 0
    x_ref = refs[idx]; idx += 1
    layers = []
    for _ in range(n_layers):
        layers.append(refs[idx:idx + 3]); idx += 3
    w_heads_ref, b_heads_ref = refs[idx], refs[idx + 1]; idx += 2
    out_ref = refs[idx]; idx += 1
    gproj_sc, hstates_sc = refs[idx], refs[idx + 1]

    H, Bb, T = hidden, batch_block, seq_len

    def mxu_dot(a, b):
        # Big, off-critical-path matmuls: optionally bf16 operands, f32 acc.
        return jnp.dot(a.astype(mxu_dtype), b.astype(mxu_dtype),
                       preferred_element_type=jnp.float32)

    def run_layer(layer_in, wih_ref, whh_ref, b_ref):
        # Hoisted input projection over all timesteps: one big MXU matmul,
        # bias folded in once (not re-broadcast every step).
        gproj_sc[...] = mxu_dot(layer_in, wih_ref[...]) + b_ref[...]
        whh = whh_ref[...]  # hoisted weight load (stays f32: latency-bound)

        def step(t, carry):
            h_prev, c_prev = carry                    # vreg-resident state
            row = pl.multiple_of(t * Bb, 8)           # Bb is a multiple of 8
            gates = gproj_sc[pl.ds(row, Bb), :] + jnp.dot(
                h_prev, whh, preferred_element_type=jnp.float32)
            # Single whole-vreg sigmoid (EUP); g gate recovered as
            # tanh(x) = 2*sigmoid(2x) - 1 (g columns were pre-scaled by 2).
            sig = jax.nn.sigmoid(gates)
            i_g = sig[:, 0:H]
            f_g = sig[:, H:2 * H]
            g_g = 2.0 * sig[:, 2 * H:3 * H] - 1.0
            o_g = sig[:, 3 * H:4 * H]
            c_new = f_g * c_prev + i_g * g_g
            h_new = o_g * jnp.tanh(c_new)
            hstates_sc[pl.ds(row, Bb), :] = h_new     # off the serial chain
            return (h_new, c_new)

        zeros = jnp.zeros((Bb, H), jnp.float32)
        # Capped unroll: cross-step MXU/EUP overlap without compile blowup
        # at production T.
        lax.fori_loop(0, T, step, (zeros, zeros), unroll=min(T, 8))

    # Layer 0 consumes x; later layers consume the previous layer's hidden
    # states directly from VMEM (no HBM round trip between layers).
    run_layer(x_ref[...].reshape(T * Bb, -1), *layers[0])
    for l in range(1, n_layers):
        run_layer(hstates_sc[...], *layers[l])

    # Fused heads: one (T*Bb, H) @ (H, n_out) matmul + bias; write only the
    # real n_out columns (no 128-lane padding of the HBM output).
    heads = mxu_dot(hstates_sc[...], w_heads_ref[...]) + b_heads_ref[...]
    out_ref[...] = heads.reshape(T, Bb, -1)


# ---------------------------------------------------------------------------
# Wrapper
# ---------------------------------------------------------------------------
def _round_up(v, m):
    return ((v + m - 1) // m) * m


def _vmem_limit_bytes():
    # v7x has 64 MiB physical VMEM per TC; v5e/v6e have 128 MiB. Budget 3/4.
    try:
        cap = int(pltpu.get_tpu_info().vmem_capacity_bytes)
    except Exception:
        cap = 64 * 1024 * 1024
    return cap * 3 // 4


@functools.partial(jax.jit, static_argnames=("mxu_dtype",))
def lstm_variance_forward(x, params, mxu_dtype=jnp.float32):
    """x: (B, T, input_size) float32 -> (y, z, sigma) as in the PyTorch module.

    mxu_dtype=jnp.bfloat16 enables bf16 operands (f32 accumulate) for the big
    input-projection / head matmuls on v6e/v7x; default f32 keeps results
    within 1e-4 of the f32 reference.
    """
    B, T, D_in = x.shape
    lstm_params = params["lstm"]
    w1, b1, w2, b2, w3, b3 = params["heads"]
    n_layers = len(lstm_params)
    H = lstm_params[0][1].shape[1]            # w_hh: (4H, H)

    # Megacore split: two batch chunks (one per v7x TensorCore) when the
    # batch is big enough to keep each chunk 8-sublane aligned.
    if B > 8:
        n_chunks = 2
        Bp = _round_up(B, 8 * n_chunks)
    else:
        n_chunks = 1
        Bp = _round_up(max(B, 1), 8)
    Bb = Bp // n_chunks

    # Time-major, batch padded to the chunked sublane multiple.
    x_tm = jnp.transpose(x, (1, 0, 2))        # (T, B, D)
    if Bp != B:
        x_tm = jnp.pad(x_tm, ((0, 0), (0, Bp - B), (0, 0)))

    # Pre-scale the g-gate (index 2 of i,f,g,o) columns by 2 so the kernel
    # can derive tanh from the single whole-vreg sigmoid.
    gate_scale = jnp.ones((4 * H,), jnp.float32).at[2 * H:3 * H].set(2.0)

    flat_inputs = [x_tm]
    in_specs = [pl.BlockSpec((T, Bb, D_in), lambda b: (0, b, 0))]
    for (w_ih, w_hh, b_ih, b_hh) in lstm_params:
        w_ih_t = jnp.transpose(w_ih) * gate_scale          # (in, 4H)
        w_hh_t = jnp.transpose(w_hh) * gate_scale          # (H, 4H)
        b_l = ((b_ih + b_hh) * gate_scale).reshape(1, 4 * H)
        flat_inputs += [w_ih_t, w_hh_t, b_l]
        in_specs += [pl.BlockSpec(w_ih_t.shape, lambda b: (0, 0)),
                     pl.BlockSpec(w_hh_t.shape, lambda b: (0, 0)),
                     pl.BlockSpec(b_l.shape, lambda b: (0, 0))]

    # Fused heads: [fc_1 | fc_2 | fc_3] -> (H, n_out), no lane padding.
    o1, o2, o3 = w1.shape[0], w2.shape[0], w3.shape[0]
    n_out = o1 + o2 + o3
    w_heads = jnp.transpose(jnp.concatenate([w1, w2, w3], axis=0))   # (H, n_out)
    b_heads = jnp.concatenate([b1, b2, b3]).reshape(1, n_out)
    flat_inputs += [w_heads, b_heads]
    in_specs += [pl.BlockSpec(w_heads.shape, lambda b: (0, 0)),
                 pl.BlockSpec(b_heads.shape, lambda b: (0, 0))]

    kernel = functools.partial(_fused_lstm_heads_kernel,
                               n_layers=n_layers, seq_len=T,
                               batch_block=Bb, hidden=H,
                               mxu_dtype=mxu_dtype)

    out = pl.pallas_call(
        kernel,
        grid=(n_chunks,),
        out_shape=jax.ShapeDtypeStruct((T, Bp, n_out), jnp.float32),
        in_specs=in_specs,
        out_specs=pl.BlockSpec((T, Bb, n_out), lambda b: (0, b, 0)),
        scratch_shapes=[
            pltpu.VMEM((T * Bb, 4 * H), jnp.float32),   # gproj (per chunk)
            pltpu.VMEM((T * Bb, H), jnp.float32),       # hidden states (all t)
        ],
        compiler_params=pltpu.CompilerParams(
            dimension_semantics=("parallel",),
            vmem_limit_bytes=_vmem_limit_bytes()),
    )(*flat_inputs)

    # Un-pad, restore batch-first layout (only the tiny (B, T, n_out) head
    # tensor is transposed, never (B, T, H)), slice y / z / sigma.
    out = out[:, :B, :]
    out = jnp.transpose(out, (1, 0, 2))       # (B, T, n_out)
    y = out[..., :o1]
    z = out[..., o1:o1 + o2]
    sigma = out[..., o1 + o2:o1 + o2 + o3]
    return y, z, sigma


# ---------------------------------------------------------------------------
# Pure-JAX reference (for correctness check only)
# ---------------------------------------------------------------------------
def reference_forward(x, params):
    h = x
    for (w_ih, w_hh, b_ih, b_hh) in params["lstm"]:
        H = w_hh.shape[1]
        B = h.shape[0]

        def step(carry, x_t):
            hp, cp = carry
            gates = x_t @ w_ih.T + hp @ w_hh.T + b_ih + b_hh
            i = jax.nn.sigmoid(gates[:, :H])
            f = jax.nn.sigmoid(gates[:, H:2 * H])
            g = jnp.tanh(gates[:, 2 * H:3 * H])
            o = jax.nn.sigmoid(gates[:, 3 * H:])
            c = f * cp + i * g
            hn = o * jnp.tanh(c)
            return (hn, c), hn

        init = (jnp.zeros((B, H), jnp.float32), jnp.zeros((B, H), jnp.float32))
        _, outs = lax.scan(step, init, jnp.transpose(h, (1, 0, 2)))
        h = jnp.transpose(outs, (1, 0, 2))
    B, T, H = h.shape
    flat = h.reshape(B * T, H)
    w1, b1, w2, b2, w3, b3 = params["heads"]
    y = (flat @ w1.T + b1).reshape(B, T, -1)
    z = (flat @ w2.T + b2).reshape(B, T, -1)
    s = (flat @ w3.T + b3).reshape(B, T, 1)
    return y, z, s


# ---------------------------------------------------------------------------
# Deterministic parameter construction
# ---------------------------------------------------------------------------
def make_params(key, input_size, hidden_dim, n_layers, stiffness_outputs, shape_outputs):
    keys = jax.random.split(key, 4 * n_layers + 6)
    k = iter(keys)
    scale = 1.0 / jnp.sqrt(hidden_dim)
    lstm_params = []
    for layer in range(n_layers):
        d_in = input_size if layer == 0 else hidden_dim
        w_ih = jax.random.uniform(next(k), (4 * hidden_dim, d_in), jnp.float32, -scale, scale)
        w_hh = jax.random.uniform(next(k), (4 * hidden_dim, hidden_dim), jnp.float32, -scale, scale)
        b_ih = jax.random.uniform(next(k), (4 * hidden_dim,), jnp.float32, -scale, scale)
        b_hh = jax.random.uniform(next(k), (4 * hidden_dim,), jnp.float32, -scale, scale)
        lstm_params.append((w_ih, w_hh, b_ih, b_hh))
    w1 = jax.random.uniform(next(k), (stiffness_outputs, hidden_dim), jnp.float32, -scale, scale)
    b1 = jax.random.uniform(next(k), (stiffness_outputs,), jnp.float32, -scale, scale)
    w2 = jax.random.uniform(next(k), (shape_outputs, hidden_dim), jnp.float32, -scale, scale)
    b2 = jax.random.uniform(next(k), (shape_outputs,), jnp.float32, -scale, scale)
    w3 = jax.random.uniform(next(k), (1, hidden_dim), jnp.float32, -scale, scale)
    b3 = jax.random.uniform(next(k), (1,), jnp.float32, -scale, scale)
    return {"lstm": lstm_params, "heads": (w1, b1, w2, b2, w3, b3)}


if __name__ == "__main__":
    # Small shapes consistent with the module's forward.
    batch, seq_len = 2, 8
    input_size, hidden_dim, n_layers = 16, 32, 2
    stiffness_outputs, shape_outputs = 4, 3

    key = jax.random.PRNGKey(0)
    pkey, xkey = jax.random.split(key)
    params = make_params(pkey, input_size, hidden_dim, n_layers,
                         stiffness_outputs, shape_outputs)
    x = jax.random.normal(xkey, (batch, seq_len, input_size), jnp.float32)

    y, z, sigma = lstm_variance_forward(x, params)
    jax.block_until_ready((y, z, sigma))

    # Sanity check against a pure-JAX reference of the same math.
    y_r, z_r, s_r = reference_forward(x, params)
    assert y.shape == (batch, seq_len, stiffness_outputs)
    assert z.shape == (batch, seq_len, shape_outputs)
    assert sigma.shape == (batch, seq_len, 1)
    assert jnp.allclose(y, y_r, atol=1e-4, rtol=1e-4)
    assert jnp.allclose(z, z_r, atol=1e-4, rtol=1e-4)
    assert jnp.allclose(sigma, s_r, atol=1e-4, rtol=1e-4)

    print("KERNEL_OK")
</pallas_src>

<mosaic_0001>
module attributes {stable_mosaic.version = 11 : i64} {
  func.func @_fused_lstm_heads_kernel(%arg0: i32, %arg1: memref<8x8x16xf32, #tpu.memory_space<vmem>>, %arg2: memref<16x128xf32, #tpu.memory_space<vmem>>, %arg3: memref<32x128xf32, #tpu.memory_space<vmem>>, %arg4: memref<1x128xf32, #tpu.memory_space<vmem>>, %arg5: memref<32x128xf32, #tpu.memory_space<vmem>>, %arg6: memref<32x128xf32, #tpu.memory_space<vmem>>, %arg7: memref<1x128xf32, #tpu.memory_space<vmem>>, %arg8: memref<32x8xf32, #tpu.memory_space<vmem>>, %arg9: memref<1x8xf32, #tpu.memory_space<vmem>>, %arg10: memref<8x8x8xf32, #tpu.memory_space<vmem>>, %arg11: memref<64x128xf32, #tpu.memory_space<vmem>>, %arg12: memref<64x32xf32, #tpu.memory_space<vmem>>) attributes {dimension_semantics = [#tpu.dimension_semantics<parallel>], iteration_bounds = array<i64: 1>, scalar_prefetch = 0 : i64, scratch_operands = 2 : i64, tpu.core_type = #tpu.core_type<tc>, window_params = [{transform_indices = @transform_0, window_bounds = array<i64: 8, 8, 16>}, {pipeline_mode = #tpu.pipeline_mode<synchronous>, transform_indices = @transform_1, window_bounds = array<i64: 16, 128>}, {pipeline_mode = #tpu.pipeline_mode<synchronous>, transform_indices = @transform_2, window_bounds = array<i64: 32, 128>}, {pipeline_mode = #tpu.pipeline_mode<synchronous>, transform_indices = @transform_3, window_bounds = array<i64: 1, 128>}, {pipeline_mode = #tpu.pipeline_mode<synchronous>, transform_indices = @transform_4, window_bounds = array<i64: 32, 128>}, {pipeline_mode = #tpu.pipeline_mode<synchronous>, transform_indices = @transform_5, window_bounds = array<i64: 32, 128>}, {pipeline_mode = #tpu.pipeline_mode<synchronous>, transform_indices = @transform_6, window_bounds = array<i64: 1, 128>}, {pipeline_mode = #tpu.pipeline_mode<synchronous>, transform_indices = @transform_7, window_bounds = array<i64: 32, 8>}, {pipeline_mode = #tpu.pipeline_mode<synchronous>, transform_indices = @transform_8, window_bounds = array<i64: 1, 8>}, {transform_indices = @transform_9, window_bounds = array<i64: 8, 8, 8>}]} {
    %c0 = arith.constant 0 : index
    %c0_0 = arith.constant 0 : index
    %c0_1 = arith.constant 0 : index
    %0 = vector.load %arg1[%c0, %c0_0, %c0_1] : memref<8x8x16xf32, #tpu.memory_space<vmem>>, vector<8x8x16xf32>
    %1 = vector.shape_cast %0 : vector<8x8x16xf32> to vector<64x16xf32>
    %c0_2 = arith.constant 0 : index
    %c0_3 = arith.constant 0 : index
    %2 = vector.load %arg2[%c0_2, %c0_3] : memref<16x128xf32, #tpu.memory_space<vmem>>, vector<16x128xf32>
    %cst = arith.constant dense<0.000000e+00> : vector<64x128xf32>
    %3 = tpu.matmul %1, %2, %cst {dimension_numbers = #tpu.dot_dimension_numbers<[1], [0], [0], [1], [0, 0, 1, 1], [], []>} : vector<64x16xf32>, vector<16x128xf32>, vector<64x128xf32> -> vector<64x128xf32>
    %c0_4 = arith.constant 0 : index
    %c0_5 = arith.constant 0 : index
    %4 = vector.load %arg4[%c0_4, %c0_5] : memref<1x128xf32, #tpu.memory_space<vmem>>, vector<1x128xf32>
    %5 = vector.broadcast %4 : vector<1x128xf32> to vector<64x128xf32>
    %6 = arith.addf %3, %5 : vector<64x128xf32>
    %c0_6 = arith.constant 0 : index
    %c0_7 = arith.constant 0 : index
    %7 = vector.load %arg11[%c0_6, %c0_7] : memref<64x128xf32, #tpu.memory_space<vmem>>, vector<64x128xf32>
    tpu.vector_store %arg11[%c0_6, %c0_7], %6 {strides = array<i32>} : memref<64x128xf32, #tpu.memory_space<vmem>>, vector<64x128xf32>,
    %c0_8 = arith.constant 0 : index
    %c0_9 = arith.constant 0 : index
    %8 = vector.load %arg3[%c0_8, %c0_9] : memref<32x128xf32, #tpu.memory_space<vmem>>, vector<32x128xf32>
    %cst_10 = arith.constant 0.000000e+00 : f32
    %9 = vector.broadcast %cst_10 : f32 to vector<8x32xf32>
    %c0_i32 = arith.constant 0 : i32
    %c8_i32 = arith.constant 8 : i32
    %10 = arith.muli %c0_i32, %c8_i32 : i32
    %11 = tpu.assume_multiple %10, 8 : i32
    %12 = arith.index_cast %11 : i32 to index
    %c0_11 = arith.constant 0 : index
    %13 = vector.load %arg11[%12, %c0_11] : memref<64x128xf32, #tpu.memory_space<vmem>>, vector<8x128xf32>
    %cst_12 = arith.constant dense<0.000000e+00> : vector<8x128xf32>
    %14 = tpu.matmul %9, %8, %cst_12 {dimension_numbers = #tpu.dot_dimension_numbers<[1], [0], [0], [1], [0, 0, 1, 1], [], []>} : vector<8x32xf32>, vector<32x128xf32>, vector<8x128xf32> -> vector<8x128xf32>
    %15 = arith.addf %13, %14 : vector<8x128xf32>
    %16 = arith.negf %15 : vector<8x128xf32>
    %17 = math.exp %16 : vector<8x128xf32>
    %cst_13 = arith.constant 1.000000e+00 : f32
    %18 = vector.broadcast %cst_13 : f32 to vector<8x128xf32>
    %19 = arith.addf %18, %17 : vector<8x128xf32>
    %20 = arith.divf %18, %19 : vector<8x128xf32>
    %21 = vector.extract_strided_slice %20 {offsets = [0, 0], sizes = [8, 32], strides = [1, 1]} : vector<8x128xf32> to vector<8x32xf32>
    %22 = vector.extract_strided_slice %20 {offsets = [0, 32], sizes = [8, 32], strides = [1, 1]} : vector<8x128xf32> to vector<8x32xf32>
    %23 = vector.extract_strided_slice %20 {offsets = [0, 64], sizes = [8, 32], strides = [1, 1]} : vector<8x128xf32> to vector<8x32xf32>
    %cst_14 = arith.constant 2.000000e+00 : f32
    %24 = vector.broadcast %cst_14 : f32 to vector<8x32xf32>
    %25 = arith.mulf %24, %23 : vector<8x32xf32>
    %cst_15 = arith.constant 1.000000e+00 : f32
    %26 = vector.broadcast %cst_15 : f32 to vector<8x32xf32>
    %27 = arith.subf %25, %26 : vector<8x32xf32>
    %28 = vector.extract_strided_slice %20 {offsets = [0, 96], sizes = [8, 32], strides = [1, 1]} : vector<8x128xf32> to vector<8x32xf32>
    %29 = arith.mulf %22, %9 : vector<8x32xf32>
    %30 = arith.mulf %21, %27 : vector<8x32xf32>
    %31 = arith.addf %29, %30 : vector<8x32xf32>
    %32 = math.tanh %31 : vector<8x32xf32>
    %33 = arith.mulf %28, %32 : vector<8x32xf32>
    %34 = arith.index_cast %11 : i32 to index
    %c0_16 = arith.constant 0 : index
    %35 = vector.load %arg12[%34, %c0_16] : memref<64x32xf32, #tpu.memory_space<vmem>>, vector<8x32xf32>
    tpu.vector_store %arg12[%34, %c0_16], %33 {strides = array<i32>} : memref<64x32xf32, #tpu.memory_space<vmem>>, vector<8x32xf32>,
    %c1_i32 = arith.constant 1 : i32
    %c8_i32_17 = arith.constant 8 : i32
    %36 = arith.muli %c1_i32, %c8_i32_17 : i32
    %37 = tpu.assume_multiple %36, 8 : i32
    %38 = arith.index_cast %37 : i32 to index
    %c0_18 = arith.constant 0 : index
    %39 = vector.load %arg11[%38, %c0_18] : memref<64x128xf32, #tpu.memory_space<vmem>>, vector<8x128xf32>
    %cst_19 = arith.constant dense<0.000000e+00> : vector<8x128xf32>
    %40 = tpu.matmul %33, %8, %cst_19 {dimension_numbers = #tpu.dot_dimension_numbers<[1], [0], [0], [1], [0, 0, 1, 1], [], []>} : vector<8x32xf32>, vector<32x128xf32>, vector<8x128xf32> -> vector<8x128xf32>
    %41 = arith.addf %39, %40 : vector<8x128xf32>
    %42 = arith.negf %41 : vector<8x128xf32>
    %43 = math.exp %42 : vector<8x128xf32>
    %cst_20 = arith.constant 1.000000e+00 : f32
    %44 = vector.broadcast %cst_20 : f32 to vector<8x128xf32>
    %45 = arith.addf %44, %43 : vector<8x128xf32>
    %46 = arith.divf %44, %45 : vector<8x128xf32>
    %47 = vector.extract_strided_slice %46 {offsets = [0, 0], sizes = [8, 32], strides = [1, 1]} : vector<8x128xf32> to vector<8x32xf32>
    %48 = vector.extract_strided_slice %46 {offsets = [0, 32], sizes = [8, 32], strides = [1, 1]} : vector<8x128xf32> to vector<8x32xf32>
    %49 = vector.extract_strided_slice %46 {offsets = [0, 64], sizes = [8, 32], strides = [1, 1]} : vector<8x128xf32> to vector<8x32xf32>
    %cst_21 = arith.constant 2.000000e+00 : f32
    %50 = vector.broadcast %cst_21 : f32 to vector<8x32xf32>
    %51 = arith.mulf %50, %49 : vector<8x32xf32>
    %cst_22 = arith.constant 1.000000e+00 : f32
    %52 = vector.broadcast %cst_22 : f32 to vector<8x32xf32>
    %53 = arith.subf %51, %52 : vector<8x32xf32>
    %54 = vector.extract_strided_slice %46 {offsets = [0, 96], sizes = [8, 32], strides = [1, 1]} : vector<8x128xf32> to vector<8x32xf32>
    %55 = arith.mulf %48, %31 : vector<8x32xf32>
    %56 = arith.mulf %47, %53 : vector<8x32xf32>
    %57 = arith.addf %55, %56 : vector<8x32xf32>
    %58 = math.tanh %57 : vector<8x32xf32>
    %59 = arith.mulf %54, %58 : vector<8x32xf32>
    %60 = arith.index_cast %37 : i32 to index
    %c0_23 = arith.constant 0 : index
    %61 = vector.load %arg12[%60, %c0_23] : memref<64x32xf32, #tpu.memory_space<vmem>>, vector<8x32xf32>
    tpu.vector_store %arg12[%60, %c0_23], %59 {strides = array<i32>} : memref<64x32xf32, #tpu.memory_space<vmem>>, vector<8x32xf32>,
    %c2_i32 = arith.constant 2 : i32
    %c8_i32_24 = arith.constant 8 : i32
    %62 = arith.muli %c2_i32, %c8_i32_24 : i32
    %63 = tpu.assume_multiple %62, 8 : i32
    %64 = arith.index_cast %63 : i32 to index
    %c0_25 = arith.constant 0 : index
    %65 = vector.load %arg11[%64, %c0_25] : memref<64x128xf32, #tpu.memory_space<vmem>>, vector<8x128xf32>
    %cst_26 = arith.constant dense<0.000000e+00> : vector<8x128xf32>
    %66 = tpu.matmul %59, %8, %cst_26 {dimension_numbers = #tpu.dot_dimension_numbers<[1], [0], [0], [1], [0, 0, 1, 1], [], []>} : vector<8x32xf32>, vector<32x128xf32>, vector<8x128xf32> -> vector<8x128xf32>
    %67 = arith.addf %65, %66 : vector<8x128xf32>
    %68 = arith.negf %67 : vector<8x128xf32>
    %69 = math.exp %68 : vector<8x128xf32>
    %cst_27 = arith.constant 1.000000e+00 : f32
    %70 = vector.broadcast %cst_27 : f32 to vector<8x128xf32>
    %71 = arith.addf %70, %69 : vector<8x128xf32>
    %72 = arith.divf %70, %71 : vector<8x128xf32>
    %73 = vector.extract_strided_slice %72 {offsets = [0, 0], sizes = [8, 32], strides = [1, 1]} : vector<8x128xf32> to vector<8x32xf32>
    %74 = vector.extract_strided_slice %72 {offsets = [0, 32], sizes = [8, 32], strides = [1, 1]} : vector<8x128xf32> to vector<8x32xf32>
    %75 = vector.extract_strided_slice %72 {offsets = [0, 64], sizes = [8, 32], strides = [1, 1]} : vector<8x128xf32> to vector<8x32xf32>
    %cst_28 = arith.constant 2.000000e+00 : f32
    %76 = vector.broadcast %cst_28 : f32 to vector<8x32xf32>
    %77 = arith.mulf %76, %75 : vector<8x32xf32>
    %cst_29 = arith.constant 1.000000e+00 : f32
    %78 = vector.broadcast %cst_29 : f32 to vector<8x32xf32>
    %79 = arith.subf %77, %78 : vector<8x32xf32>
    %80 = vector.extract_strided_slice %72 {offsets = [0, 96], sizes = [8, 32], strides = [1, 1]} : vector<8x128xf32> to vector<8x32xf32>
    %81 = arith.mulf %74, %57 : vector<8x32xf32>
    %82 = arith.mulf %73, %79 : vector<8x32xf32>
    %83 = arith.addf %81, %82 : vector<8x32xf32>
    %84 = math.tanh %83 : vector<8x32xf32>
    %85 = arith.mulf %80, %84 : vector<8x32xf32>
    %86 = arith.index_cast %63 : i32 to index
    %c0_30 = arith.constant 0 : index
    %87 = vector.load %arg12[%86, %c0_30] : memref<64x32xf32, #tpu.memory_space<vmem>>, vector<8x32xf32>
    tpu.vector_store %arg12[%86, %c0_30], %85 {strides = array<i32>} : memref<64x32xf32, #tpu.memory_space<vmem>>, vector<8x32xf32>,
    %c3_i32 = arith.constant 3 : i32
    %c8_i32_31 = arith.constant 8 : i32
    %88 = arith.muli %c3_i32, %c8_i32_31 : i32
    %89 = tpu.assume_multiple %88, 8 : i32
    %90 = arith.index_cast %89 : i32 to index
    %c0_32 = arith.constant 0 : index
    %91 = vector.load %arg11[%90, %c0_32] : memref<64x128xf32, #tpu.memory_space<vmem>>, vector<8x128xf32>
    %cst_33 = arith.constant dense<0.000000e+00> : vector<8x128xf32>
    %92 = tpu.matmul %85, %8, %cst_33 {dimension_numbers = #tpu.dot_dimension_numbers<[1], [0], [0], [1], [0, 0, 1, 1], [], []>} : vector<8x32xf32>, vector<32x128xf32>, vector<8x128xf32> -> vector<8x128xf32>
    %93 = arith.addf %91, %92 : vector<8x128xf32>
    %94 = arith.negf %93 : vector<8x128xf32>
    %95 = math.exp %94 : vector<8x128xf32>
    %cst_34 = arith.constant 1.000000e+00 : f32
    %96 = vector.broadcast %cst_34 : f32 to vector<8x128xf32>
    %97 = arith.addf %96, %95 : vector<8x128xf32>
    %98 = arith.divf %96, %97 : vector<8x128xf32>
    %99 = vector.extract_strided_slice %98 {offsets = [0, 0], sizes = [8, 32], strides = [1, 1]} : vector<8x128xf32> to vector<8x32xf32>
    %100 = vector.extract_strided_slice %98 {offsets = [0, 32], sizes = [8, 32], strides = [1, 1]} : vector<8x128xf32> to vector<8x32xf32>
    %101 = vector.extract_strided_slice %98 {offsets = [0, 64], sizes = [8, 32], strides = [1, 1]} : vector<8x128xf32> to vector<8x32xf32>
    %cst_35 = arith.constant 2.000000e+00 : f32
    %102 = vector.broadcast %cst_35 : f32 to vector<8x32xf32>
    %103 = arith.mulf %102, %101 : vector<8x32xf32>
    %cst_36 = arith.constant 1.000000e+00 : f32
    %104 = vector.broadcast %cst_36 : f32 to vector<8x32xf32>
    %105 = arith.subf %103, %104 : vector<8x32xf32>
    %106 = vector.extract_strided_slice %98 {offsets = [0, 96], sizes = [8, 32], strides = [1, 1]} : vector<8x128xf32> to vector<8x32xf32>
    %107 = arith.mulf %100, %83 : vector<8x32xf32>
    %108 = arith.mulf %99, %105 : vector<8x32xf32>
    %109 = arith.addf %107, %108 : vector<8x32xf32>
    %110 = math.tanh %109 : vector<8x32xf32>
    %111 = arith.mulf %106, %110 : vector<8x32xf32>
    %112 = arith.index_cast %89 : i32 to index
    %c0_37 = arith.constant 0 : index
    %113 = vector.load %arg12[%112, %c0_37] : memref<64x32xf32, #tpu.memory_space<vmem>>, vector<8x32xf32>
    tpu.vector_store %arg12[%112, %c0_37], %111 {strides = array<i32>} : memref<64x32xf32, #tpu.memory_space<vmem>>, vector<8x32xf32>,
    %c4_i32 = arith.constant 4 : i32
    %c8_i32_38 = arith.constant 8 : i32
    %114 = arith.muli %c4_i32, %c8_i32_38 : i32
    %115 = tpu.assume_multiple %114, 8 : i32
    %116 = arith.index_cast %115 : i32 to index
    %c0_39 = arith.constant 0 : index
    %117 = vector.load %arg11[%116, %c0_39] : memref<64x128xf32, #tpu.memory_space<vmem>>, vector<8x128xf32>
    %cst_40 = arith.constant dense<0.000000e+00> : vector<8x128xf32>
    %118 = tpu.matmul %111, %8, %cst_40 {dimension_numbers = #tpu.dot_dimension_numbers<[1], [0], [0], [1], [0, 0, 1, 1], [], []>} : vector<8x32xf32>, vector<32x128xf32>, vector<8x128xf32> -> vector<8x128xf32>
    %119 = arith.addf %117, %118 : vector<8x128xf32>
    %120 = arith.negf %119 : vector<8x128xf32>
    %121 = math.exp %120 : vector<8x128xf32>
    %cst_41 = arith.constant 1.000000e+00 : f32
    %122 = vector.broadcast %cst_41 : f32 to vector<8x128xf32>
    %123 = arith.addf %122, %121 : vector<8x128xf32>
    %124 = arith.divf %122, %123 : vector<8x128xf32>
    %125 = vector.extract_strided_slice %124 {offsets = [0, 0], sizes = [8, 32], strides = [1, 1]} : vector<8x128xf32> to vector<8x32xf32>
    %126 = vector.extract_strided_slice %124 {offsets = [0, 32], sizes = [8, 32], strides = [1, 1]} : vector<8x128xf32> to vector<8x32xf32>
    %127 = vector.extract_strided_slice %124 {offsets = [0, 64], sizes = [8, 32], strides = [1, 1]} : vector<8x128xf32> to vector<8x32xf32>
    %cst_42 = arith.constant 2.000000e+00 : f32
    %128 = vector.broadcast %cst_42 : f32 to vector<8x32xf32>
    %129 = arith.mulf %128, %127 : vector<8x32xf32>
    %cst_43 = arith.constant 1.000000e+00 : f32
    %130 = vector.broadcast %cst_43 : f32 to vector<8x32xf32>
    %131 = arith.subf %129, %130 : vector<8x32xf32>
    %132 = vector.extract_strided_slice %124 {offsets = [0, 96], sizes = [8, 32], strides = [1, 1]} : vector<8x128xf32> to vector<8x32xf32>
    %133 = arith.mulf %126, %109 : vector<8x32xf32>
    %134 = arith.mulf %125, %131 : vector<8x32xf32>
    %135 = arith.addf %133, %134 : vector<8x32xf32>
    %136 = math.tanh %135 : vector<8x32xf32>
    %137 = arith.mulf %132, %136 : vector<8x32xf32>
    %138 = arith.index_cast %115 : i32 to index
    %c0_44 = arith.constant 0 : index
    %139 = vector.load %arg12[%138, %c0_44] : memref<64x32xf32, #tpu.memory_space<vmem>>, vector<8x32xf32>
    tpu.vector_store %arg12[%138, %c0_44], %137 {strides = array<i32>} : memref<64x32xf32, #tpu.memory_space<vmem>>, vector<8x32xf32>,
    %c5_i32 = arith.constant 5 : i32
    %c8_i32_45 = arith.constant 8 : i32
    %140 = arith.muli %c5_i32, %c8_i32_45 : i32
    %141 = tpu.assume_multiple %140, 8 : i32
    %142 = arith.index_cast %141 : i32 to index
    %c0_46 = arith.constant 0 : index
    %143 = vector.load %arg11[%142, %c0_46] : memref<64x128xf32, #tpu.memory_space<vmem>>, vector<8x128xf32>
    %cst_47 = arith.constant dense<0.000000e+00> : vector<8x128xf32>
    %144 = tpu.matmul %137, %8, %cst_47 {dimension_numbers = #tpu.dot_dimension_numbers<[1], [0], [0], [1], [0, 0, 1, 1], [], []>} : vector<8x32xf32>, vector<32x128xf32>, vector<8x128xf32> -> vector<8x128xf32>
    %145 = arith.addf %143, %144 : vector<8x128xf32>
    %146 = arith.negf %145 : vector<8x128xf32>
    %147 = math.exp %146 : vector<8x128xf32>
    %cst_48 = arith.constant 1.000000e+00 : f32
    %148 = vector.broadcast %cst_48 : f32 to vector<8x128xf32>
    %149 = arith.addf %148, %147 : vector<8x128xf32>
    %150 = arith.divf %148, %149 : vector<8x128xf32>
    %151 = vector.extract_strided_slice %150 {offsets = [0, 0], sizes = [8, 32], strides = [1, 1]} : vector<8x128xf32> to vector<8x32xf32>
    %152 = vector.extract_strided_slice %150 {offsets = [0, 32], sizes = [8, 32], strides = [1, 1]} : vector<8x128xf32> to vector<8x32xf32>
    %153 = vector.extract_strided_slice %150 {offsets = [0, 64], sizes = [8, 32], strides = [1, 1]} : vector<8x128xf32> to vector<8x32xf32>
    %cst_49 = arith.constant 2.000000e+00 : f32
    %154 = vector.broadcast %cst_49 : f32 to vector<8x32xf32>
    %155 = arith.mulf %154, %153 : vector<8x32xf32>
    %cst_50 = arith.constant 1.000000e+00 : f32
    %156 = vector.broadcast %cst_50 : f32 to vector<8x32xf32>
    %157 = arith.subf %155, %156 : vector<8x32xf32>
    %158 = vector.extract_strided_slice %150 {offsets = [0, 96], sizes = [8, 32], strides = [1, 1]} : vector<8x128xf32> to vector<8x32xf32>
    %159 = arith.mulf %152, %135 : vector<8x32xf32>
    %160 = arith.mulf %151, %157 : vector<8x32xf32>
    %161 = arith.addf %159, %160 : vector<8x32xf32>
    %162 = math.tanh %161 : vector<8x32xf32>
    %163 = arith.mulf %158, %162 : vector<8x32xf32>
    %164 = arith.index_cast %141 : i32 to index
    %c0_51 = arith.constant 0 : index
    %165 = vector.load %arg12[%164, %c0_51] : memref<64x32xf32, #tpu.memory_space<vmem>>, vector<8x32xf32>
    tpu.vector_store %arg12[%164, %c0_51], %163 {strides = array<i32>} : memref<64x32xf32, #tpu.memory_space<vmem>>, vector<8x32xf32>,
    %c6_i32 = arith.constant 6 : i32
    %c8_i32_52 = arith.constant 8 : i32
    %166 = arith.muli %c6_i32, %c8_i32_52 : i32
    %167 = tpu.assume_multiple %166, 8 : i32
    %168 = arith.index_cast %167 : i32 to index
    %c0_53 = arith.constant 0 : index
    %169 = vector.load %arg11[%168, %c0_53] : memref<64x128xf32, #tpu.memory_space<vmem>>, vector<8x128xf32>
    %cst_54 = arith.constant dense<0.000000e+00> : vector<8x128xf32>
    %170 = tpu.matmul %163, %8, %cst_54 {dimension_numbers = #tpu.dot_dimension_numbers<[1], [0], [0], [1], [0, 0, 1, 1], [], []>} : vector<8x32xf32>, vector<32x128xf32>, vector<8x128xf32> -> vector<8x128xf32>
    %171 = arith.addf %169, %170 : vector<8x128xf32>
    %172 = arith.negf %171 : vector<8x128xf32>
    %173 = math.exp %172 : vector<8x128xf32>
    %cst_55 = arith.constant 1.000000e+00 : f32
    %174 = vector.broadcast %cst_55 : f32 to vector<8x128xf32>
    %175 = arith.addf %174, %173 : vector<8x128xf32>
    %176 = arith.divf %174, %175 : vector<8x128xf32>
    %177 = vector.extract_strided_slice %176 {offsets = [0, 0], sizes = [8, 32], strides = [1, 1]} : vector<8x128xf32> to vector<8x32xf32>
    %178 = vector.extract_strided_slice %176 {offsets = [0, 32], sizes = [8, 32], strides = [1, 1]} : vector<8x128xf32> to vector<8x32xf32>
    %179 = vector.extract_strided_slice %176 {offsets = [0, 64], sizes = [8, 32], strides = [1, 1]} : vector<8x128xf32> to vector<8x32xf32>
    %cst_56 = arith.constant 2.000000e+00 : f32
    %180 = vector.broadcast %cst_56 : f32 to vector<8x32xf32>
    %181 = arith.mulf %180, %179 : vector<8x32xf32>
    %cst_57 = arith.constant 1.000000e+00 : f32
    %182 = vector.broadcast %cst_57 : f32 to vector<8x32xf32>
    %183 = arith.subf %181, %182 : vector<8x32xf32>
    %184 = vector.extract_strided_slice %176 {offsets = [0, 96], sizes = [8, 32], strides = [1, 1]} : vector<8x128xf32> to vector<8x32xf32>
    %185 = arith.mulf %178, %161 : vector<8x32xf32>
    %186 = arith.mulf %177, %183 : vector<8x32xf32>
    %187 = arith.addf %185, %186 : vector<8x32xf32>
    %188 = math.tanh %187 : vector<8x32xf32>
    %189 = arith.mulf %184, %188 : vector<8x32xf32>
    %190 = arith.index_cast %167 : i32 to index
    %c0_58 = arith.constant 0 : index
    %191 = vector.load %arg12[%190, %c0_58] : memref<64x32xf32, #tpu.memory_space<vmem>>, vector<8x32xf32>
    tpu.vector_store %arg12[%190, %c0_58], %189 {strides = array<i32>} : memref<64x32xf32, #tpu.memory_space<vmem>>, vector<8x32xf32>,
    %c7_i32 = arith.constant 7 : i32
    %c8_i32_59 = arith.constant 8 : i32
    %192 = arith.muli %c7_i32, %c8_i32_59 : i32
    %193 = tpu.assume_multiple %192, 8 : i32
    %194 = arith.index_cast %193 : i32 to index
    %c0_60 = arith.constant 0 : index
    %195 = vector.load %arg11[%194, %c0_60] : memref<64x128xf32, #tpu.memory_space<vmem>>, vector<8x128xf32>
    %cst_61 = arith.constant dense<0.000000e+00> : vector<8x128xf32>
    %196 = tpu.matmul %189, %8, %cst_61 {dimension_numbers = #tpu.dot_dimension_numbers<[1], [0], [0], [1], [0, 0, 1, 1], [], []>} : vector<8x32xf32>, vector<32x128xf32>, vector<8x128xf32> -> vector<8x128xf32>
    %197 = arith.addf %195, %196 : vector<8x128xf32>
    %198 = arith.negf %197 : vector<8x128xf32>
    %199 = math.exp %198 : vector<8x128xf32>
    %cst_62 = arith.constant 1.000000e+00 : f32
    %200 = vector.broadcast %cst_62 : f32 to vector<8x128xf32>
    %201 = arith.addf %200, %199 : vector<8x128xf32>
    %202 = arith.divf %200, %201 : vector<8x128xf32>
    %203 = vector.extract_strided_slice %202 {offsets = [0, 0], sizes = [8, 32], strides = [1, 1]} : vector<8x128xf32> to vector<8x32xf32>
    %204 = vector.extract_strided_slice %202 {offsets = [0, 32], sizes = [8, 32], strides = [1, 1]} : vector<8x128xf32> to vector<8x32xf32>
    %205 = vector.extract_strided_slice %202 {offsets = [0, 64], sizes = [8, 32], strides = [1, 1]} : vector<8x128xf32> to vector<8x32xf32>
    %cst_63 = arith.constant 2.000000e+00 : f32
    %206 = vector.broadcast %cst_63 : f32 to vector<8x32xf32>
    %207 = arith.mulf %206, %205 : vector<8x32xf32>
    %cst_64 = arith.constant 1.000000e+00 : f32
    %208 = vector.broadcast %cst_64 : f32 to vector<8x32xf32>
    %209 = arith.subf %207, %208 : vector<8x32xf32>
    %210 = vector.extract_strided_slice %202 {offsets = [0, 96], sizes = [8, 32], strides = [1, 1]} : vector<8x128xf32> to vector<8x32xf32>
    %211 = arith.mulf %204, %187 : vector<8x32xf32>
    %212 = arith.mulf %203, %209 : vector<8x32xf32>
    %213 = arith.addf %211, %212 : vector<8x32xf32>
    %214 = math.tanh %213 : vector<8x32xf32>
    %215 = arith.mulf %210, %214 : vector<8x32xf32>
    %216 = arith.index_cast %193 : i32 to index
    %c0_65 = arith.constant 0 : index
    %217 = vector.load %arg12[%216, %c0_65] : memref<64x32xf32, #tpu.memory_space<vmem>>, vector<8x32xf32>
    tpu.vector_store %arg12[%216, %c0_65], %215 {strides = array<i32>} : memref<64x32xf32, #tpu.memory_space<vmem>>, vector<8x32xf32>,
    %c8_i32_66 = arith.constant 8 : i32
    %c0_67 = arith.constant 0 : index
    %c0_68 = arith.constant 0 : index
    %218 = vector.load %arg12[%c0_67, %c0_68] : memref<64x32xf32, #tpu.memory_space<vmem>>, vector<64x32xf32>
    %c0_69 = arith.constant 0 : index
    %c0_70 = arith.constant 0 : index
    %219 = vector.load %arg5[%c0_69, %c0_70] : memref<32x128xf32, #tpu.memory_space<vmem>>, vector<32x128xf32>
    %cst_71 = arith.constant dense<0.000000e+00> : vector<64x128xf32>
    %220 = tpu.matmul %218, %219, %cst_71 {dimension_numbers = #tpu.dot_dimension_numbers<[1], [0], [0], [1], [0, 0, 1, 1], [], []>} : vector<64x32xf32>, vector<32x128xf32>, vector<64x128xf32> -> vector<64x128xf32>
    %c0_72 = arith.constant 0 : index
    %c0_73 = arith.constant 0 : index
    %221 = vector.load %arg7[%c0_72, %c0_73] : memref<1x128xf32, #tpu.memory_space<vmem>>, vector<1x128xf32>
    %222 = vector.broadcast %221 : vector<1x128xf32> to vector<64x128xf32>
    %223 = arith.addf %220, %222 : vector<64x128xf32>
    %c0_74 = arith.constant 0 : index
    %c0_75 = arith.constant 0 : index
    %224 = vector.load %arg11[%c0_74, %c0_75] : memref<64x128xf32, #tpu.memory_space<vmem>>, vector<64x128xf32>
    tpu.vector_store %arg11[%c0_74, %c0_75], %223 {strides = array<i32>} : memref<64x128xf32, #tpu.memory_space<vmem>>, vector<64x128xf32>,
    %c0_76 = arith.constant 0 : index
    %c0_77 = arith.constant 0 : index
    %225 = vector.load %arg6[%c0_76, %c0_77] : memref<32x128xf32, #tpu.memory_space<vmem>>, vector<32x128xf32>
    %cst_78 = arith.constant 0.000000e+00 : f32
    %226 = vector.broadcast %cst_78 : f32 to vector<8x32xf32>
    %c0_i32_79 = arith.constant 0 : i32
    %c8_i32_80 = arith.constant 8 : i32
    %227 = arith.muli %c0_i32_79, %c8_i32_80 : i32
    %228 = tpu.assume_multiple %227, 8 : i32
    %229 = arith.index_cast %228 : i32 to index
    %c0_81 = arith.constant 0 : index
    %230 = vector.load %arg11[%229, %c0_81] : memref<64x128xf32, #tpu.memory_space<vmem>>, vector<8x128xf32>
    %cst_82 = arith.constant dense<0.000000e+00> : vector<8x128xf32>
    %231 = tpu.matmul %226, %225, %cst_82 {dimension_numbers = #tpu.dot_dimension_numbers<[1], [0], [0], [1], [0, 0, 1, 1], [], []>} : vector<8x32xf32>, vector<32x128xf32>, vector<8x128xf32> -> vector<8x128xf32>
    %232 = arith.addf %230, %231 : vector<8x128xf32>
    %233 = arith.negf %232 : vector<8x128xf32>
    %234 = math.exp %233 : vector<8x128xf32>
    %cst_83 = arith.constant 1.000000e+00 : f32
    %235 = vector.broadcast %cst_83 : f32 to vector<8x128xf32>
    %236 = arith.addf %235, %234 : vector<8x128xf32>
    %237 = arith.divf %235, %236 : vector<8x128xf32>
    %238 = vector.extract_strided_slice %237 {offsets = [0, 0], sizes = [8, 32], strides = [1, 1]} : vector<8x128xf32> to vector<8x32xf32>
    %239 = vector.extract_strided_slice %237 {offsets = [0, 32], sizes = [8, 32], strides = [1, 1]} : vector<8x128xf32> to vector<8x32xf32>
    %240 = vector.extract_strided_slice %237 {offsets = [0, 64], sizes = [8, 32], strides = [1, 1]} : vector<8x128xf32> to vector<8x32xf32>
    %cst_84 = arith.constant 2.000000e+00 : f32
    %241 = vector.broadcast %cst_84 : f32 to vector<8x32xf32>
    %242 = arith.mulf %241, %240 : vector<8x32xf32>
    %cst_85 = arith.constant 1.000000e+00 : f32
    %243 = vector.broadcast %cst_85 : f32 to vector<8x32xf32>
    %244 = arith.subf %242, %243 : vector<8x32xf32>
    %245 = vector.extract_strided_slice %237 {offsets = [0, 96], sizes = [8, 32], strides = [1, 1]} : vector<8x128xf32> to vector<8x32xf32>
    %246 = arith.mulf %239, %226 : vector<8x32xf32>
    %247 = arith.mulf %238, %244 : vector<8x32xf32>
    %248 = arith.addf %246, %247 : vector<8x32xf32>
    %249 = math.tanh %248 : vector<8x32xf32>
    %250 = arith.mulf %245, %249 : vector<8x32xf32>
    %251 = arith.index_cast %228 : i32 to index
    %c0_86 = arith.constant 0 : index
    %252 = vector.load %arg12[%251, %c0_86] : memref<64x32xf32, #tpu.memory_space<vmem>>, vector<8x32xf32>
    tpu.vector_store %arg12[%251, %c0_86], %250 {strides = array<i32>} : memref<64x32xf32, #tpu.memory_space<vmem>>, vector<8x32xf32>,
    %c1_i32_87 = arith.constant 1 : i32
    %c8_i32_88 = arith.constant 8 : i32
    %253 = arith.muli %c1_i32_87, %c8_i32_88 : i32
    %254 = tpu.assume_multiple %253, 8 : i32
    %255 = arith.index_cast %254 : i32 to index
    %c0_89 = arith.constant 0 : index
    %256 = vector.load %arg11[%255, %c0_89] : memref<64x128xf32, #tpu.memory_space<vmem>>, vector<8x128xf32>
    %cst_90 = arith.constant dense<0.000000e+00> : vector<8x128xf32>
    %257 = tpu.matmul %250, %225, %cst_90 {dimension_numbers = #tpu.dot_dimension_numbers<[1], [0], [0], [1], [0, 0, 1, 1], [], []>} : vector<8x32xf32>, vector<32x128xf32>, vector<8x128xf32> -> vector<8x128xf32>
    %258 = arith.addf %256, %257 : vector<8x128xf32>
    %259 = arith.negf %258 : vector<8x128xf32>
    %260 = math.exp %259 : vector<8x128xf32>
    %cst_91 = arith.constant 1.000000e+00 : f32
    %261 = vector.broadcast %cst_91 : f32 to vector<8x128xf32>
    %262 = arith.addf %261, %260 : vector<8x128xf32>
    %263 = arith.divf %261, %262 : vector<8x128xf32>
    %264 = vector.extract_strided_slice %263 {offsets = [0, 0], sizes = [8, 32], strides = [1, 1]} : vector<8x128xf32> to vector<8x32xf32>
    %265 = vector.extract_strided_slice %263 {offsets = [0, 32], sizes = [8, 32], strides = [1, 1]} : vector<8x128xf32> to vector<8x32xf32>
    %266 = vector.extract_strided_slice %263 {offsets = [0, 64], sizes = [8, 32], strides = [1, 1]} : vector<8x128xf32> to vector<8x32xf32>
    %cst_92 = arith.constant 2.000000e+00 : f32
    %267 = vector.broadcast %cst_92 : f32 to vector<8x32xf32>
    %268 = arith.mulf %267, %266 : vector<8x32xf32>
    %cst_93 = arith.constant 1.000000e+00 : f32
    %269 = vector.broadcast %cst_93 : f32 to vector<8x32xf32>
    %270 = arith.subf %268, %269 : vector<8x32xf32>
    %271 = vector.extract_strided_slice %263 {offsets = [0, 96], sizes = [8, 32], strides = [1, 1]} : vector<8x128xf32> to vector<8x32xf32>
    %272 = arith.mulf %265, %248 : vector<8x32xf32>
    %273 = arith.mulf %264, %270 : vector<8x32xf32>
    %274 = arith.addf %272, %273 : vector<8x32xf32>
    %275 = math.tanh %274 : vector<8x32xf32>
    %276 = arith.mulf %271, %275 : vector<8x32xf32>
    %277 = arith.index_cast %254 : i32 to index
    %c0_94 = arith.constant 0 : index
    %278 = vector.load %arg12[%277, %c0_94] : memref<64x32xf32, #tpu.memory_space<vmem>>, vector<8x32xf32>
    tpu.vector_store %arg12[%277, %c0_94], %276 {strides = array<i32>} : memref<64x32xf32, #tpu.memory_space<vmem>>, vector<8x32xf32>,
    %c2_i32_95 = arith.constant 2 : i32
    %c8_i32_96 = arith.constant 8 : i32
    %279 = arith.muli %c2_i32_95, %c8_i32_96 : i32
    %280 = tpu.assume_multiple %279, 8 : i32
    %281 = arith.index_cast %280 : i32 to index
    %c0_97 = arith.constant 0 : index
    %282 = vector.load %arg11[%281, %c0_97] : memref<64x128xf32, #tpu.memory_space<vmem>>, vector<8x128xf32>
    %cst_98 = arith.constant dense<0.000000e+00> : vector<8x128xf32>
    %283 = tpu.matmul %276, %225, %cst_98 {dimension_numbers = #tpu.dot_dimension_numbers<[1], [0], [0], [1], [0, 0, 1, 1], [], []>} : vector<8x32xf32>, vector<32x128xf32>, vector<8x128xf32> -> vector<8x128xf32>
    %284 = arith.addf %282, %283 : vector<8x128xf32>
    %285 = arith.negf %284 : vector<8x128xf32>
    %286 = math.exp %285 : vector<8x128xf32>
    %cst_99 = arith.constant 1.000000e+00 : f32
    %287 = vector.broadcast %cst_99 : f32 to vector<8x128xf32>
    %288 = arith.addf %287, %286 : vector<8x128xf32>
    %289 = arith.divf %287, %288 : vector<8x128xf32>
    %290 = vector.extract_strided_slice %289 {offsets = [0, 0], sizes = [8, 32], strides = [1, 1]} : vector<8x128xf32> to vector<8x32xf32>
    %291 = vector.extract_strided_slice %289 {offsets = [0, 32], sizes = [8, 32], strides = [1, 1]} : vector<8x128xf32> to vector<8x32xf32>
    %292 = vector.extract_strided_slice %289 {offsets = [0, 64], sizes = [8, 32], strides = [1, 1]} : vector<8x128xf32> to vector<8x32xf32>
    %cst_100 = arith.constant 2.000000e+00 : f32
    %293 = vector.broadcast %cst_100 : f32 to vector<8x32xf32>
    %294 = arith.mulf %293, %292 : vector<8x32xf32>
    %cst_101 = arith.constant 1.000000e+00 : f32
    %295 = vector.broadcast %cst_101 : f32 to vector<8x32xf32>
    %296 = arith.subf %294, %295 : vector<8x32xf32>
    %297 = vector.extract_strided_slice %289 {offsets = [0, 96], sizes = [8, 32], strides = [1, 1]} : vector<8x128xf32> to vector<8x32xf32>
    %298 = arith.mulf %291, %274 : vector<8x32xf32>
    %299 = arith.mulf %290, %296 : vector<8x32xf32>
    %300 = arith.addf %298, %299 : vector<8x32xf32>
    %301 = math.tanh %300 : vector<8x32xf32>
    %302 = arith.mulf %297, %301 : vector<8x32xf32>
    %303 = arith.index_cast %280 : i32 to index
    %c0_102 = arith.constant 0 : index
    %304 = vector.load %arg12[%303, %c0_102] : memref<64x32xf32, #tpu.memory_space<vmem>>, vector<8x32xf32>
    tpu.vector_store %arg12[%303, %c0_102], %302 {strides = array<i32>} : memref<64x32xf32, #tpu.memory_space<vmem>>, vector<8x32xf32>,
    %c3_i32_103 = arith.constant 3 : i32
    %c8_i32_104 = arith.constant 8 : i32
    %305 = arith.muli %c3_i32_103, %c8_i32_104 : i32
    %306 = tpu.assume_multiple %305, 8 : i32
    %307 = arith.index_cast %306 : i32 to index
    %c0_105 = arith.constant 0 : index
    %308 = vector.load %arg11[%307, %c0_105] : memref<64x128xf32, #tpu.memory_space<vmem>>, vector<8x128xf32>
    %cst_106 = arith.constant dense<0.000000e+00> : vector<8x128xf32>
    %309 = tpu.matmul %302, %225, %cst_106 {dimension_numbers = #tpu.dot_dimension_numbers<[1], [0], [0], [1], [0, 0, 1, 1], [], []>} : vector<8x32xf32>, vector<32x128xf32>, vector<8x128xf32> -> vector<8x128xf32>
    %310 = arith.addf %308, %309 : vector<8x128xf32>
    %311 = arith.negf %310 : vector<8x128xf32>
    %312 = math.exp %311 : vector<8x128xf32>
    %cst_107 = arith.constant 1.000000e+00 : f32
    %313 = vector.broadcast %cst_107 : f32 to vector<8x128xf32>
    %314 = arith.addf %313, %312 : vector<8x128xf32>
    %315 = arith.divf %313, %314 : vector<8x128xf32>
    %316 = vector.extract_strided_slice %315 {offsets = [0, 0], sizes = [8, 32], strides = [1, 1]} : vector<8x128xf32> to vector<8x32xf32>
    %317 = vector.extract_strided_slice %315 {offsets = [0, 32], sizes = [8, 32], strides = [1, 1]} : vector<8x128xf32> to vector<8x32xf32>
    %318 = vector.extract_strided_slice %315 {offsets = [0, 64], sizes = [8, 32], strides = [1, 1]} : vector<8x128xf32> to vector<8x32xf32>
    %cst_108 = arith.constant 2.000000e+00 : f32
    %319 = vector.broadcast %cst_108 : f32 to vector<8x32xf32>
    %320 = arith.mulf %319, %318 : vector<8x32xf32>
    %cst_109 = arith.constant 1.000000e+00 : f32
    %321 = vector.broadcast %cst_109 : f32 to vector<8x32xf32>
    %322 = arith.subf %320, %321 : vector<8x32xf32>
    %323 = vector.extract_strided_slice %315 {offsets = [0, 96], sizes = [8, 32], strides = [1, 1]} : vector<8x128xf32> to vector<8x32xf32>
    %324 = arith.mulf %317, %300 : vector<8x32xf32>
    %325 = arith.mulf %316, %322 : vector<8x32xf32>
    %326 = arith.addf %324, %325 : vector<8x32xf32>
    %327 = math.tanh %326 : vector<8x32xf32>
    %328 = arith.mulf %323, %327 : vector<8x32xf32>
    %329 = arith.index_cast %306 : i32 to index
    %c0_110 = arith.constant 0 : index
    %330 = vector.load %arg12[%329, %c0_110] : memref<64x32xf32, #tpu.memory_space<vmem>>, vector<8x32xf32>
    tpu.vector_store %arg12[%329, %c0_110], %328 {strides = array<i32>} : memref<64x32xf32, #tpu.memory_space<vmem>>, vector<8x32xf32>,
    %c4_i32_111 = arith.constant 4 : i32
    %c8_i32_112 = arith.constant 8 : i32
    %331 = arith.muli %c4_i32_111, %c8_i32_112 : i32
    %332 = tpu.assume_multiple %331, 8 : i32
    %333 = arith.index_cast %332 : i32 to index
    %c0_113 = arith.constant 0 : index
    %334 = vector.load %arg11[%333, %c0_113] : memref<64x128xf32, #tpu.memory_space<vmem>>, vector<8x128xf32>
    %cst_114 = arith.constant dense<0.000000e+00> : vector<8x128xf32>
    %335 = tpu.matmul %328, %225, %cst_114 {dimension_numbers = #tpu.dot_dimension_numbers<[1], [0], [0], [1], [0, 0, 1, 1], [], []>} : vector<8x32xf32>, vector<32x128xf32>, vector<8x128xf32> -> vector<8x128xf32>
    %336 = arith.addf %334, %335 : vector<8x128xf32>
    %337 = arith.negf %336 : vector<8x128xf32>
    %338 = math.exp %337 : vector<8x128xf32>
    %cst_115 = arith.constant 1.000000e+00 : f32
    %339 = vector.broadcast %cst_115 : f32 to vector<8x128xf32>
    %340 = arith.addf %339, %338 : vector<8x128xf32>
    %341 = arith.divf %339, %340 : vector<8x128xf32>
    %342 = vector.extract_strided_slice %341 {offsets = [0, 0], sizes = [8, 32], strides = [1, 1]} : vector<8x128xf32> to vector<8x32xf32>
    %343 = vector.extract_strided_slice %341 {offsets = [0, 32], sizes = [8, 32], strides = [1, 1]} : vector<8x128xf32> to vector<8x32xf32>
    %344 = vector.extract_strided_slice %341 {offsets = [0, 64], sizes = [8, 32], strides = [1, 1]} : vector<8x128xf32> to vector<8x32xf32>
    %cst_116 = arith.constant 2.000000e+00 : f32
    %345 = vector.broadcast %cst_116 : f32 to vector<8x32xf32>
    %346 = arith.mulf %345, %344 : vector<8x32xf32>
    %cst_117 = arith.constant 1.000000e+00 : f32
    %347 = vector.broadcast %cst_117 : f32 to vector<8x32xf32>
    %348 = arith.subf %346, %347 : vector<8x32xf32>
    %349 = vector.extract_strided_slice %341 {offsets = [0, 96], sizes = [8, 32], strides = [1, 1]} : vector<8x128xf32> to vector<8x32xf32>
    %350 = arith.mulf %343, %326 : vector<8x32xf32>
    %351 = arith.mulf %342, %348 : vector<8x32xf32>
    %352 = arith.addf %350, %351 : vector<8x32xf32>
    %353 = math.tanh %352 : vector<8x32xf32>
    %354 = arith.mulf %349, %353 : vector<8x32xf32>
    %355 = arith.index_cast %332 : i32 to index
    %c0_118 = arith.constant 0 : index
    %356 = vector.load %arg12[%355, %c0_118] : memref<64x32xf32, #tpu.memory_space<vmem>>, vector<8x32xf32>
    tpu.vector_store %arg12[%355, %c0_118], %354 {strides = array<i32>} : memref<64x32xf32, #tpu.memory_space<vmem>>, vector<8x32xf32>,
    %c5_i32_119 = arith.constant 5 : i32
    %c8_i32_120 = arith.constant 8 : i32
    %357 = arith.muli %c5_i32_119, %c8_i32_120 : i32
    %358 = tpu.assume_multiple %357, 8 : i32
    %359 = arith.index_cast %358 : i32 to index
    %c0_121 = arith.constant 0 : index
    %360 = vector.load %arg11[%359, %c0_121] : memref<64x128xf32, #tpu.memory_space<vmem>>, vector<8x128xf32>
    %cst_122 = arith.constant dense<0.000000e+00> : vector<8x128xf32>
    %361 = tpu.matmul %354, %225, %cst_122 {dimension_numbers = #tpu.dot_dimension_numbers<[1], [0], [0], [1], [0, 0, 1, 1], [], []>} : vector<8x32xf32>, vector<32x128xf32>, vector<8x128xf32> -> vector<8x128xf32>
    %362 = arith.addf %360, %361 : vector<8x128xf32>
    %363 = arith.negf %362 : vector<8x128xf32>
    %364 = math.exp %363 : vector<8x128xf32>
    %cst_123 = arith.constant 1.000000e+00 : f32
    %365 = vector.broadcast %cst_123 : f32 to vector<8x128xf32>
    %366 = arith.addf %365, %364 : vector<8x128xf32>
    %367 = arith.divf %365, %366 : vector<8x128xf32>
    %368 = vector.extract_strided_slice %367 {offsets = [0, 0], sizes = [8, 32], strides = [1, 1]} : vector<8x128xf32> to vector<8x32xf32>
    %369 = vector.extract_strided_slice %367 {offsets = [0, 32], sizes = [8, 32], strides = [1, 1]} : vector<8x128xf32> to vector<8x32xf32>
    %370 = vector.extract_strided_slice %367 {offsets = [0, 64], sizes = [8, 32], strides = [1, 1]} : vector<8x128xf32> to vector<8x32xf32>
    %cst_124 = arith.constant 2.000000e+00 : f32
    %371 = vector.broadcast %cst_124 : f32 to vector<8x32xf32>
    %372 = arith.mulf %371, %370 : vector<8x32xf32>
    %cst_125 = arith.constant 1.000000e+00 : f32
    %373 = vector.broadcast %cst_125 : f32 to vector<8x32xf32>
    %374 = arith.subf %372, %373 : vector<8x32xf32>
    %375 = vector.extract_strided_slice %367 {offsets = [0, 96], sizes = [8, 32], strides = [1, 1]} : vector<8x128xf32> to vector<8x32xf32>
    %376 = arith.mulf %369, %352 : vector<8x32xf32>
    %377 = arith.mulf %368, %374 : vector<8x32xf32>
    %378 = arith.addf %376, %377 : vector<8x32xf32>
    %379 = math.tanh %378 : vector<8x32xf32>
    %380 = arith.mulf %375, %379 : vector<8x32xf32>
    %381 = arith.index_cast %358 : i32 to index
    %c0_126 = arith.constant 0 : index
    %382 = vector.load %arg12[%381, %c0_126] : memref<64x32xf32, #tpu.memory_space<vmem>>, vector<8x32xf32>
    tpu.vector_store %arg12[%381, %c0_126], %380 {strides = array<i32>} : memref<64x32xf32, #tpu.memory_space<vmem>>, vector<8x32xf32>,
    %c6_i32_127 = arith.constant 6 : i32
    %c8_i32_128 = arith.constant 8 : i32
    %383 = arith.muli %c6_i32_127, %c8_i32_128 : i32
    %384 = tpu.assume_multiple %383, 8 : i32
    %385 = arith.index_cast %384 : i32 to index
    %c0_129 = arith.constant 0 : index
    %386 = vector.load %arg11[%385, %c0_129] : memref<64x128xf32, #tpu.memory_space<vmem>>, vector<8x128xf32>
    %cst_130 = arith.constant dense<0.000000e+00> : vector<8x128xf32>
    %387 = tpu.matmul %380, %225, %cst_130 {dimension_numbers = #tpu.dot_dimension_numbers<[1], [0], [0], [1], [0, 0, 1, 1], [], []>} : vector<8x32xf32>, vector<32x128xf32>, vector<8x128xf32> -> vector<8x128xf32>
    %388 = arith.addf %386, %387 : vector<8x128xf32>
    %389 = arith.negf %388 : vector<8x128xf32>
    %390 = math.exp %389 : vector<8x128xf32>
    %cst_131 = arith.constant 1.000000e+00 : f32
    %391 = vector.broadcast %cst_131 : f32 to vector<8x128xf32>
    %392 = arith.addf %391, %390 : vector<8x128xf32>
    %393 = arith.divf %391, %392 : vector<8x128xf32>
    %394 = vector.extract_strided_slice %393 {offsets = [0, 0], sizes = [8, 32], strides = [1, 1]} : vector<8x128xf32> to vector<8x32xf32>
    %395 = vector.extract_strided_slice %393 {offsets = [0, 32], sizes = [8, 32], strides = [1, 1]} : vector<8x128xf32> to vector<8x32xf32>
    %396 = vector.extract_strided_slice %393 {offsets = [0, 64], sizes = [8, 32], strides = [1, 1]} : vector<8x128xf32> to vector<8x32xf32>
    %cst_132 = arith.constant 2.000000e+00 : f32
    %397 = vector.broadcast %cst_132 : f32 to vector<8x32xf32>
    %398 = arith.mulf %397, %396 : vector<8x32xf32>
    %cst_133 = arith.constant 1.000000e+00 : f32
    %399 = vector.broadcast %cst_133 : f32 to vector<8x32xf32>
    %400 = arith.subf %398, %399 : vector<8x32xf32>
    %401 = vector.extract_strided_slice %393 {offsets = [0, 96], sizes = [8, 32], strides = [1, 1]} : vector<8x128xf32> to vector<8x32xf32>
    %402 = arith.mulf %395, %378 : vector<8x32xf32>
    %403 = arith.mulf %394, %400 : vector<8x32xf32>
    %404 = arith.addf %402, %403 : vector<8x32xf32>
    %405 = math.tanh %404 : vector<8x32xf32>
    %406 = arith.mulf %401, %405 : vector<8x32xf32>
    %407 = arith.index_cast %384 : i32 to index
    %c0_134 = arith.constant 0 : index
    %408 = vector.load %arg12[%407, %c0_134] : memref<64x32xf32, #tpu.memory_space<vmem>>, vector<8x32xf32>
    tpu.vector_store %arg12[%407, %c0_134], %406 {strides = array<i32>} : memref<64x32xf32, #tpu.memory_space<vmem>>, vector<8x32xf32>,
    %c7_i32_135 = arith.constant 7 : i32
    %c8_i32_136 = arith.constant 8 : i32
    %409 = arith.muli %c7_i32_135, %c8_i32_136 : i32
    %410 = tpu.assume_multiple %409, 8 : i32
    %411 = arith.index_cast %410 : i32 to index
    %c0_137 = arith.constant 0 : index
    %412 = vector.load %arg11[%411, %c0_137] : memref<64x128xf32, #tpu.memory_space<vmem>>, vector<8x128xf32>
    %cst_138 = arith.constant dense<0.000000e+00> : vector<8x128xf32>
    %413 = tpu.matmul %406, %225, %cst_138 {dimension_numbers = #tpu.dot_dimension_numbers<[1], [0], [0], [1], [0, 0, 1, 1], [], []>} : vector<8x32xf32>, vector<32x128xf32>, vector<8x128xf32> -> vector<8x128xf32>
    %414 = arith.addf %412, %413 : vector<8x128xf32>
    %415 = arith.negf %414 : vector<8x128xf32>
    %416 = math.exp %415 : vector<8x128xf32>
    %cst_139 = arith.constant 1.000000e+00 : f32
    %417 = vector.broadcast %cst_139 : f32 to vector<8x128xf32>
    %418 = arith.addf %417, %416 : vector<8x128xf32>
    %419 = arith.divf %417, %418 : vector<8x128xf32>
    %420 = vector.extract_strided_slice %419 {offsets = [0, 0], sizes = [8, 32], strides = [1, 1]} : vector<8x128xf32> to vector<8x32xf32>
    %421 = vector.extract_strided_slice %419 {offsets = [0, 32], sizes = [8, 32], strides = [1, 1]} : vector<8x128xf32> to vector<8x32xf32>
    %422 = vector.extract_strided_slice %419 {offsets = [0, 64], sizes = [8, 32], strides = [1, 1]} : vector<8x128xf32> to vector<8x32xf32>
    %cst_140 = arith.constant 2.000000e+00 : f32
    %423 = vector.broadcast %cst_140 : f32 to vector<8x32xf32>
    %424 = arith.mulf %423, %422 : vector<8x32xf32>
    %cst_141 = arith.constant 1.000000e+00 : f32
    %425 = vector.broadcast %cst_141 : f32 to vector<8x32xf32>
    %426 = arith.subf %424, %425 : vector<8x32xf32>
    %427 = vector.extract_strided_slice %419 {offsets = [0, 96], sizes = [8, 32], strides = [1, 1]} : vector<8x128xf32> to vector<8x32xf32>
    %428 = arith.mulf %421, %404 : vector<8x32xf32>
    %429 = arith.mulf %420, %426 : vector<8x32xf32>
    %430 = arith.addf %428, %429 : vector<8x32xf32>
    %431 = math.tanh %430 : vector<8x32xf32>
    %432 = arith.mulf %427, %431 : vector<8x32xf32>
    %433 = arith.index_cast %410 : i32 to index
    %c0_142 = arith.constant 0 : index
    %434 = vector.load %arg12[%433, %c0_142] : memref<64x32xf32, #tpu.memory_space<vmem>>, vector<8x32xf32>
    tpu.vector_store %arg12[%433, %c0_142], %432 {strides = array<i32>} : memref<64x32xf32, #tpu.memory_space<vmem>>, vector<8x32xf32>,
    %c8_i32_143 = arith.constant 8 : i32
    %c0_144 = arith.constant 0 : index
    %c0_145 = arith.constant 0 : index
    %435 = vector.load %arg12[%c0_144, %c0_145] : memref<64x32xf32, #tpu.memory_space<vmem>>, vector<64x32xf32>
    %c0_146 = arith.constant 0 : index
    %c0_147 = arith.constant 0 : index
    %436 = vector.load %arg8[%c0_146, %c0_147] : memref<32x8xf32, #tpu.memory_space<vmem>>, vector<32x8xf32>
    %cst_148 = arith.constant dense<0.000000e+00> : vector<64x8xf32>
    %437 = tpu.matmul %435, %436, %cst_148 {dimension_numbers = #tpu.dot_dimension_numbers<[1], [0], [0], [1], [0, 0, 1, 1], [], []>} : vector<64x32xf32>, vector<32x8xf32>, vector<64x8xf32> -> vector<64x8xf32>
    %c0_149 = arith.constant 0 : index
    %c0_150 = arith.constant 0 : index
    %438 = vector.load %arg9[%c0_149, %c0_150] : memref<1x8xf32, #tpu.memory_space<vmem>>, vector<1x8xf32>
    %439 = vector.broadcast %438 : vector<1x8xf32> to vector<64x8xf32>
    %440 = arith.addf %437, %439 : vector<64x8xf32>
    %441 = vector.shape_cast %440 : vector<64x8xf32> to vector<8x8x8xf32>
    %c0_151 = arith.constant 0 : index
    %c0_152 = arith.constant 0 : index
    %c0_153 = arith.constant 0 : index
    %442 = vector.load %arg10[%c0_151, %c0_152, %c0_153] : memref<8x8x8xf32, #tpu.memory_space<vmem>>, vector<8x8x8xf32>
    tpu.vector_store %arg10[%c0_151, %c0_152, %c0_153], %441 {strides = array<i32>} : memref<8x8x8xf32, #tpu.memory_space<vmem>>, vector<8x8x8xf32>,
    return
  }
  func.func @transform_0(%arg0: i32) -> (i32, i32, i32) {
    %c0_i32 = arith.constant 0 : i32
    %c0_i32_0 = arith.constant 0 : i32
    %c0_i32_1 = arith.constant 0 : i32
    return %c0_i32, %arg0, %c0_i32_0 : i32, i32, i32
  }
  func.func @transform_1(%arg0: i32) -> (i32, i32) {
    %c0_i32 = arith.constant 0 : i32
    %c0_i32_0 = arith.constant 0 : i32
    %c0_i32_1 = arith.constant 0 : i32
    return %c0_i32, %c0_i32_0 : i32, i32
  }
  func.func @transform_2(%arg0: i32) -> (i32, i32) {
    %c0_i32 = arith.constant 0 : i32
    %c0_i32_0 = arith.constant 0 : i32
    %c0_i32_1 = arith.constant 0 : i32
    return %c0_i32, %c0_i32_0 : i32, i32
  }
  func.func @transform_3(%arg0: i32) -> (i32, i32) {
    %c0_i32 = arith.constant 0 : i32
    %c0_i32_0 = arith.constant 0 : i32
    %c0_i32_1 = arith.constant 0 : i32
    return %c0_i32, %c0_i32_0 : i32, i32
  }
  func.func @transform_4(%arg0: i32) -> (i32, i32) {
    %c0_i32 = arith.constant 0 : i32
    %c0_i32_0 = arith.constant 0 : i32
    %c0_i32_1 = arith.constant 0 : i32
    return %c0_i32, %c0_i32_0 : i32, i32
  }
  func.func @transform_5(%arg0: i32) -> (i32, i32) {
    %c0_i32 = arith.constant 0 : i32
    %c0_i32_0 = arith.constant 0 : i32
    %c0_i32_1 = arith.constant 0 : i32
    return %c0_i32, %c0_i32_0 : i32, i32
  }
  func.func @transform_6(%arg0: i32) -> (i32, i32) {
    %c0_i32 = arith.constant 0 : i32
    %c0_i32_0 = arith.constant 0 : i32
    %c0_i32_1 = arith.constant 0 : i32
    return %c0_i32, %c0_i32_0 : i32, i32
  }
  func.func @transform_7(%arg0: i32) -> (i32, i32) {
    %c0_i32 = arith.constant 0 : i32
    %c0_i32_0 = arith.constant 0 : i32
    %c0_i32_1 = arith.constant 0 : i32
    return %c0_i32, %c0_i32_0 : i32, i32
  }
  func.func @transform_8(%arg0: i32) -> (i32, i32) {
    %c0_i32 = arith.constant 0 : i32
    %c0_i32_0 = arith.constant 0 : i32
    %c0_i32_1 = arith.constant 0 : i32
    return %c0_i32, %c0_i32_0 : i32, i32
  }
  func.func @transform_9(%arg0: i32) -> (i32, i32, i32) {
    %c0_i32 = arith.constant 0 : i32
    %c0_i32_0 = arith.constant 0 : i32
    %c0_i32_1 = arith.constant 0 : i32
    return %c0_i32, %arg0, %c0_i32_0 : i32, i32, i32
  }
}

</mosaic_0001>

<bundles_post_ra>
// kernel: lstm_variance_forward.1
= control target key start
LH: loop header
LB: loop body
LE: loop exit
PB: predicated region body
PF: predicated region fallthrough
CT: control target
= control target key end

     0   :  { %vm49_vm0 = vcmask 130048   ;;  %v2828_v10 = vmov 0.0|0.0   ;;  %vm2829_vm1 = vmmov 0   ;;  %v2830_v16 = vmov 0.0   ;;  %s2831_s12 = smov 64   ;;  %s3297_s1 = inlined_call_operand.vmem [shape: f32[16,128], index: 1, kind: input, shape index: {}]   ;;  %s3298_s0 = inlined_call_operand.vmem [shape: f32[8,8,16], index: 0, kind: input, shape index: {}]   ;;  %s3299_s2 = inlined_call_operand.vmem [shape: f32[32,128], index: 2, kind: input, shape index: {}]   ;;  %s3300_s3 = inlined_call_operand.vmem [shape: f32[1,128], index: 3, kind: input, shape index: {}]   ;;  %s3301_s4 = inlined_call_operand.vmem [shape: f32[32,128], index: 4, kind: input, shape index: {}]   ;;  %s3302_s5 = inlined_call_operand.vmem [shape: f32[32,128], index: 5, kind: input, shape index: {}]   ;;  %s3303_s6 = inlined_call_operand.vmem [shape: f32[1,128], index: 6, kind: input, shape index: {}]   ;;  %s3304_s7 = inlined_call_operand.vmem [shape: f32[32,8], index: 7, kind: input, shape index: {}]   ;;  %s3305_s8 = inlined_call_operand.vmem [shape: f32[1,8], index: 8, kind: input, shape index: {}]   ;;  %s3306_s9 = inlined_call_operand.vmem [shape: f32[8,8,8], index: 9, kind: output, shape index: {}]  }
   0x1   :  { %v40_v0 = vld [vmem:[%s3297_s1] sm:$0xff]  ;;  %v41_v1 = vld [vmem:[%s3297_s1 + $0x8] sm:$0xff]  ;;  %v38_v11 = vld [vmem:[%s3298_s0 + $0x30] sm:$0xff]  ;;  %vm192_vm2 = vcmask 261120   ;;  %vm2177_vm3 = vcmask 64512  }
   0x2   :  { %v36_v2 = vld [vmem:[%s3298_s0 + $0x20] sm:$0xff]  ;;  %v2609_v3 = vpack.c.bf16 %v41_v1, %v40_v0  ;;  %v188_v5 = vld [vmem:[%s3299_s2 + $0x8] sm:$0xff]  ;;  %v189_v12 = vld [vmem:[%s3299_s2 + $0x10] sm:$0xff] }
   0x3   :  { %2387 = vmatprep.mubr.msk.f32.mxu1 %vm49_vm0, %v36_v2  ;;  %v187_v4 = vld [vmem:[%s3299_s2] sm:$0xff]  ;;  %v37_v7 = vld [vmem:[%s3298_s0 + $0x28] sm:$0xff]  ;;  %v190_v13 = vld [vmem:[%s3299_s2 + $0x18] sm:$0xff] }
   0x4   :  { %v32_v6 = vld [vmem:[%s3298_s0] sm:$0xff]  ;;  %2725 = vmatprep.subr.bf16.mxu1 %v2609_v3  ;;  %2610 = vmatprep.subr.bf16.mxu0 %v2609_v3  ;;  %v2905_v8 = vpack.c.bf16 %v188_v5, %v187_v4  ;;  %v33_v9 = vld [vmem:[%s3298_s0 + $0x8] sm:$0xff]  ;;  %v39_v14 = vld [vmem:[%s3298_s0 + $0x38] sm:$0xff]  ;;  %v2929_v15 = vpack.c.bf16 %v190_v13, %v189_v12 }
   0x5   :  { %2726 = vmatpush3.bf16.msra.mxu1 %v2609_v3  ;;  %2612 = vmatpush3.bf16.msra.mxu0 %v2609_v3  ;;  %v2955_v21 = vld [vmem:[%s3300_s3] ss:$0 sm:$0xff]  ;;  %s2832_s3 = smov 32   ;;  %v34_v58 = vld [vmem:[%s3298_s0 + $0x10] sm:$0xff]  ;;  %v35_v59 = vld [vmem:[%s3298_s0 + $0x18] sm:$0xff] }
   0x6   :  { %2613 = vmatprep.subr.bf16.mxu1 %v2828_v10  ;;  %2381 = vmatprep.mubr.msk.f32.mxu0 %vm49_vm0, %v32_v6 }
   0x7   :  { %2625 = vmatprep.subr.bf16.mxu0 %v2828_v10 }
   0x8   :  { %2388 = vmatmul.mubr.msk.f32.vlgmr.msra.gmra.mrb[0].mxu1 %vm49_vm0, %v37_v7  ;;  %2382 = vmatmul.mubr.msk.f32.vlgmr.msra.gmra.mrb[0].mxu0 %vm49_vm0, %v33_v9 }
   0x9   :  { %2615 = vmatpush3.bf16.msra.mxu1 %v2905_v8  ;;  %2390 = vmatprep.mubr.msk.f32.mxu1 %vm49_vm0, %v38_v11 }
   0xa   :  { %2616 = vmatprep.subr.bf16.mxu1 %v2828_v10  ;;  %2627 = vmatpush3.bf16.msra.mxu0 %v2905_v8 }
   0xb   :  { %2628 = vmatprep.subr.bf16.mxu0 %v2828_v10  ;;  %2384 = vmatprep.mubr.msk.f32.mxu0 %vm49_vm0, %v34_v58 }
   0xc   :  { %2391 = vmatmul.mubr.msk.f32.gmra.mrb[2].mxu1 %vm49_vm0, %v39_v14  ;;  %2385 = vmatmul.mubr.msk.f32.gmra.mrb[2].mxu0 %vm49_vm0, %v35_v59 }
   0xd   :  { %2618 = vmatpush3.bf16.msra.mxu1 %v2929_v15  ;;  %2401 = vmatprep.mubr.msk.f32.mxu1 %vm2829_vm1, %v2830_v16 }
   0xe   :  { %2619 = vmatprep.subr.bf16.mxu1 %v2828_v10  ;;  %2630 = vmatpush3.bf16.msra.mxu0 %v2929_v15 }
   0xf   :  { %2637 = vmatprep.subr.bf16.mxu0 %v2828_v10  ;;  %2423 = vmatprep.mubr.msk.f32.mxu0 %vm2829_vm1, %v2830_v16 }
  0x10   :  { %2402 = vmatmul.mubr.f32.vlgmr.msra.gmra.mrb[4].mxu1 %v2830_v16 }
  0x11   :  { %2621 = vmatpush3.bf16.msra.mxu1 %v2905_v8  ;;  %2412 = vmatprep.mubr.msk.f32.mxu1 %vm2829_vm1, %v2830_v16 }
  0x12   :  { %2622 = vmatprep.subr.bf16.mxu1 %v2828_v10 }
  0x15   :  { %2624 = vmatpush3.bf16.msra.mxu1 %v2929_v15 }
  0x16   :  { %2631 = vmatprep.subr.bf16.mxu1 %v2828_v10 }
  0xdb   :  { %v2948_v17 = vpop.f32.mrb[0].mxu1  ;;  %v2383_v18 = vpop.f32.mrb[0].mxu0 }
  0xdc   :  { %v2950_v19 = vpop.f32.mrb[1].mxu1  ;;  %v140_v20 = vpop.f32.mrb[1].mxu0  ;;  %v146_v43 = vadd.f32 %v2383_v18, %v2955_v21 }
  0xdd   :  { %v141_v24 = vadd.f32 %v2955_v21, %v140_v20 }
  0xdf   :  { %v2957_v22 = vpop.f32.mrb[2].mxu1  ;;  %v2386_v63 = vpop.f32.mrb[2].mxu0 }
  0xe0   :  { %v2959_v23 = vpop.f32.mrb[3].mxu1  ;;  %v150_v0 = vpop.f32.mrb[3].mxu0 }
  0xe1   :  { %v151_v2 = vadd.f32 %v2955_v21, %v150_v0 }
  0xe3   :  { %v262_v25 = vpop.f32.mrb[4].mxu1 }
  0xe4   :  { %v266_v26 = vadd.f32 %v262_v25, %v141_v24  ;;  %v2403_v27 = vpop.f32.mrb[5].mxu1 }
  0xe6   :  { %v2199_v28 = vmul.f32 -1.442695, %v266_v26 }
  0xe8   :  { %2732 = vpow2.f32 %v2199_v28 }
  0xf2   :  { %v2733_v29 = vpop.eup %2732 }
  0xf3   :  { %v270_v30 = vadd.f32 1.0, %v2733_v29 }
  0xf5   :  { %2734 = vrcp.f32 %v270_v30  ;;  %v156_v30 = vadd.f32 %v2386_v63, %v2955_v21 }
  0xff   :  { %v2735_v31 = vpop.eup %2734 }
 0x100   :  { %v273_v32 = vmul.f32 2.0, %v2735_v31  ;;  %v275_v36 = vmul.f32 0.0, %v2735_v31 }
 0x102   :  { %v2200_v33 = vadd.f32 -1.0, %v273_v32 }
 0x104   :  { %277 = vrot.lane.b32.xlu0 %v2200_v33, %s2831_s12 }
 0x176   :  { %v278_v34 = vpop.permute.xlu0 %277 }
 0x177   :  { %v280_v35 = vmul.f32 %v2735_v31, %v278_v34 }
 0x179   :  { %282 = vrot.lane.b32.xlu0 %v280_v35, %s2832_s3 }
 0x1eb   :  { %v283_v37 = vpop.permute.xlu0 %282 }
 0x1ec   :  { %v285_v38 = vadd.f32 %v283_v37, %v275_v36 }
 0x1ee   :  { %2736 = vtanh.f32 %v285_v38 }
 0x1f8   :  { %v2737_v39 = vpop.eup %2736 }
 0x1f9   :  { %288 = vrot.lane.b32.xlu1 %v2737_v39, %s2831_s12 }
 0x26b   :  { %v289_v40 = vpop.permute.xlu1 %288 }
 0x26c   :  { %v291_v41 = vmul.f32 %v2735_v31, %v289_v40 }
 0x26e   :  { %293 = vrot.lane.b32.xlu1 %v291_v41, %s2832_s3 }
 0x2e0   :  { %v294_v42 = vpop.permute.xlu1 %293 }
 0x2e1   :  { %296 = vst.msk [vmem:[#allocation3] sm:$0xff] %vm192_vm2, %v294_v42  ;;  %2413 = vmatmul.mubr.msk.f32.vlgmr.msra.gmra.mrb[6].mxu1 %vm192_vm2, %v294_v42 }
 0x2e2   :  { %2633 = vmatpush3.bf16.msra.mxu1 %v2905_v8  ;;  %2434 = vmatprep.mubr.msk.f32.mxu1 %vm2829_vm1, %v2830_v16 }
 0x2e3   :  { %2634 = vmatprep.subr.bf16.mxu1 %v2828_v10 }
 0x2e6   :  { %2636 = vmatpush3.bf16.msra.mxu1 %v2929_v15 }
 0x2e7   :  { %2643 = vmatprep.subr.bf16.mxu1 %v2828_v10 }
 0x3b4   :  { %v367_v44 = vpop.f32.mrb[6].mxu1 }
 0x3b5   :  { %v371_v45 = vadd.f32 %v367_v44, %v146_v43  ;;  %v2414_v46 = vpop.f32.mrb[7].mxu1 }
 0x3b7   :  { %v2202_v47 = vmul.f32 -1.442695, %v371_v45 }
 0x3b9   :  { %2738 = vpow2.f32 %v2202_v47 }
 0x3c3   :  { %v2739_v48 = vpop.eup %2738 }
 0x3c4   :  { %v375_v49 = vadd.f32 1.0, %v2739_v48 }
 0x3c6   :  { %2740 = vrcp.f32 %v375_v49  ;;  %v161_v49 = vadd.f32 %v2955_v21, %v2950_v19 }
 0x3d0   :  { %v2741_v50 = vpop.eup %2740 }
 0x3d1   :  { %v378_v51 = vmul.f32 2.0, %v2741_v50  ;;  %v380_v55 = vmul.f32 %v2741_v50, %v285_v38 }
 0x3d3   :  { %v2203_v52 = vadd.f32 -1.0, %v378_v51 }
 0x3d5   :  { %382 = vrot.lane.b32.xlu0 %v2203_v52, %s2831_s12 }
 0x447   :  { %v383_v53 = vpop.permute.xlu0 %382 }
 0x448   :  { %v385_v54 = vmul.f32 %v2741_v50, %v383_v53 }
 0x44a   :  { %387 = vrot.lane.b32.xlu1 %v385_v54, %s2832_s3 }
 0x4bc   :  { %v388_v56 = vpop.permute.xlu1 %387 }
 0x4bd   :  { %v390_v57 = vadd.f32 %v388_v56, %v380_v55 }
 0x4bf   :  { %2742 = vtanh.f32 %v390_v57 }
 0x4c9   :  { %v2743_v60 = vpop.eup %2742 }
 0x4ca   :  { %393 = vrot.lane.b32.xlu0 %v2743_v60, %s2831_s12 }
 0x53c   :  { %v394_v61 = vpop.permute.xlu0 %393 }
 0x53d   :  { %v396_v62 = vmul.f32 %v2741_v50, %v394_v61 }
 0x53f   :  { %398 = vrot.lane.b32.xlu1 %v396_v62, %s2832_s3 }
 0x5b1   :  { %v399_v1 = vpop.permute.xlu1 %398 }
 0x5b2   :  { %402 = vst.msk [vmem:[#allocation3 + $0x8] sm:$0xff] %vm192_vm2, %v399_v1  ;;  %2424 = vmatmul.mubr.msk.f32.vlgmr.msra.gmra.mrb[4].mxu0 %vm192_vm2, %v399_v1 }
 0x5b3   :  { %2639 = vmatpush3.bf16.msra.mxu0 %v2905_v8  ;;  %2445 = vmatprep.mubr.msk.f32.mxu0 %vm2829_vm1, %v2830_v16 }
 0x5b4   :  { %2640 = vmatprep.subr.bf16.mxu0 %v2828_v10 }
 0x5b7   :  { %2642 = vmatpush3.bf16.msra.mxu0 %v2929_v15 }
 0x5b8   :  { %2649 = vmatprep.subr.bf16.mxu0 %v2828_v10 }
 0x685   :  { %v473_v3 = vpop.f32.mrb[4].mxu0 }
 0x686   :  { %v477_v4 = vadd.f32 %v473_v3, %v151_v2  ;;  %v2425_v5 = vpop.f32.mrb[5].mxu0  ;;  %v166_v3 = vadd.f32 %v2948_v17, %v2955_v21 }
 0x688   :  { %v2205_v6 = vmul.f32 -1.442695, %v477_v4 }
 0x68a   :  { %2744 = vpow2.f32 %v2205_v6 }
 0x694   :  { %v2745_v7 = vpop.eup %2744 }
 0x695   :  { %v481_v9 = vadd.f32 1.0, %v2745_v7 }
 0x697   :  { %2746 = vrcp.f32 %v481_v9 }
 0x6a1   :  { %v2747_v11 = vpop.eup %2746 }
 0x6a2   :  { %v484_v12 = vmul.f32 2.0, %v2747_v11  ;;  %v486_v20 = vmul.f32 %v2747_v11, %v390_v57 }
 0x6a4   :  { %v2206_v13 = vadd.f32 -1.0, %v484_v12 }
 0x6a6   :  { %488 = vrot.lane.b32.xlu0 %v2206_v13, %s2831_s12 }
 0x718   :  { %v489_v14 = vpop.permute.xlu0 %488 }
 0x719   :  { %v491_v18 = vmul.f32 %v2747_v11, %v489_v14 }
 0x71b   :  { %493 = vrot.lane.b32.xlu1 %v491_v18, %s2832_s3 }
 0x78d   :  { %v494_v24 = vpop.permute.xlu1 %493 }
 0x78e   :  { %v496_v25 = vadd.f32 %v494_v24, %v486_v20  ;;  %v1047_v24 = vld [vmem:[%s3301_s4] sm:$0xff] }
 0x790   :  { %2748 = vtanh.f32 %v496_v25 }
 0x79a   :  { %v2749_v26 = vpop.eup %2748 }
 0x79b   :  { %499 = vrot.lane.b32.xlu0 %v2749_v26, %s2831_s12 }
 0x80d   :  { %v500_v27 = vpop.permute.xlu0 %499 }
 0x80e   :  { %v502_v28 = vmul.f32 %v2747_v11, %v500_v27 }
 0x810   :  { %504 = vrot.lane.b32.xlu1 %v502_v28, %s2832_s3 }
 0x882   :  { %v505_v29 = vpop.permute.xlu1 %504 }
 0x883   :  { %508 = vst.msk [vmem:[#allocation3 + $0x10] sm:$0xff] %vm192_vm2, %v505_v29  ;;  %2435 = vmatmul.mubr.msk.f32.vlgmr.msra.gmra.mrb[8].mxu1 %vm192_vm2, %v505_v29 }
 0x884   :  { %2645 = vmatpush3.bf16.msra.mxu1 %v2905_v8  ;;  %2456 = vmatprep.mubr.msk.f32.mxu1 %vm2829_vm1, %v2830_v16 }
 0x885   :  { %2646 = vmatprep.subr.bf16.mxu1 %v2828_v10 }
 0x888   :  { %2648 = vmatpush3.bf16.msra.mxu1 %v2929_v15 }
 0x889   :  { %2655 = vmatprep.subr.bf16.mxu1 %v2828_v10 }
 0x956   :  { %v579_v31 = vpop.f32.mrb[8].mxu1 }
 0x957   :  { %v583_v32 = vadd.f32 %v579_v31, %v156_v30  ;;  %v2436_v33 = vpop.f32.mrb[9].mxu1  ;;  %v1049_v30 = vld [vmem:[%s3301_s4 + $0x10] sm:$0xff]  ;;  %v1050_v31 = vld [vmem:[%s3301_s4 + $0x18] sm:$0xff] }
 0x959   :  { %v2208_v34 = vmul.f32 -1.442695, %v583_v32  ;;  %v2665_v32 = vpack.c.bf16 %v1050_v31, %v1049_v30 }
 0x95b   :  { %2750 = vpow2.f32 %v2208_v34  ;;  %v1039_v34 = vld [vmem:[#allocation3] sm:$0xff] }
 0x965   :  { %v2751_v35 = vpop.eup %2750 }
 0x966   :  { %v587_v36 = vadd.f32 1.0, %v2751_v35  ;;  %v1040_v35 = vld [vmem:[#allocation3 + $0x8] sm:$0xff] }
 0x968   :  { %2752 = vrcp.f32 %v587_v36  ;;  %v1041_v36 = vld [vmem:[#allocation3 + $0x10] sm:$0xff] }
 0x972   :  { %v2753_v37 = vpop.eup %2752 }
 0x973   :  { %v590_v38 = vmul.f32 2.0, %v2753_v37  ;;  %v592_v42 = vmul.f32 %v2753_v37, %v496_v25  ;;  %v1048_v25 = vld [vmem:[%s3301_s4 + $0x8] sm:$0xff] }
 0x974   :  { %v2661_v26 = vpack.c.bf16 %v1048_v25, %v1047_v24 }
 0x975   :  { %v2209_v39 = vadd.f32 -1.0, %v590_v38 }
 0x977   :  { %594 = vrot.lane.b32.xlu0 %v2209_v39, %s2831_s12 }
 0x9e9   :  { %v595_v40 = vpop.permute.xlu0 %594 }
 0x9ea   :  { %v597_v41 = vmul.f32 %v2753_v37, %v595_v40  ;;  %v171_v40 = vadd.f32 %v2955_v21, %v2959_v23 }
 0x9ec   :  { %599 = vrot.lane.b32.xlu1 %v597_v41, %s2832_s3 }
 0xa5e   :  { %v600_v43 = vpop.permute.xlu1 %599 }
 0xa5f   :  { %v602_v44 = vadd.f32 %v600_v43, %v592_v42 }
 0xa61   :  { %2754 = vtanh.f32 %v602_v44 }
 0xa6b   :  { %v2755_v45 = vpop.eup %2754 }
 0xa6c   :  { %605 = vrot.lane.b32.xlu0 %v2755_v45, %s2831_s12 }
 0xade   :  { %v606_v46 = vpop.permute.xlu0 %605 }
 0xadf   :  { %v608_v47 = vmul.f32 %v2753_v37, %v606_v46 }
 0xae1   :  { %610 = vrot.lane.b32.xlu1 %v608_v47, %s2832_s3 }
 0xb53   :  { %v611_v48 = vpop.permute.xlu1 %610 }
 0xb54   :  { %614 = vst.msk [vmem:[#allocation3 + $0x18] sm:$0xff] %vm192_vm2, %v611_v48  ;;  %2446 = vmatmul.mubr.msk.f32.vlgmr.msra.gmra.mrb[6].mxu0 %vm192_vm2, %v611_v48 }
 0xb55   :  { %2651 = vmatpush3.bf16.msra.mxu0 %v2905_v8  ;;  %2467 = vmatprep.mubr.msk.f32.mxu0 %vm2829_vm1, %v2830_v16 }
 0xb56   :  { %2652 = vmatprep.subr.bf16.mxu0 %v2828_v10 }
 0xb59   :  { %2654 = vmatpush3.bf16.msra.mxu0 %v2929_v15 }
 0xb5a   :  { %2662 = vmatprep.subr.bf16.mxu0 %v2661_v26 }
 0xb5b   :  { %v1042_v37 = vld [vmem:[#allocation3 + $0x18] sm:$0xff] }
 0xc27   :  { %v685_v50 = vpop.f32.mrb[6].mxu0 }
 0xc28   :  { %v689_v51 = vadd.f32 %v685_v50, %v161_v49  ;;  %v2447_v52 = vpop.f32.mrb[7].mxu0 }
 0xc2a   :  { %v2211_v53 = vmul.f32 -1.442695, %v689_v51 }
 0xc2c   :  { %2756 = vpow2.f32 %v2211_v53 }
 0xc36   :  { %v2757_v54 = vpop.eup %2756 }
 0xc37   :  { %v693_v55 = vadd.f32 1.0, %v2757_v54 }
 0xc39   :  { %2758 = vrcp.f32 %v693_v55 }
 0xc43   :  { %v2759_v56 = vpop.eup %2758 }
 0xc44   :  { %v696_v57 = vmul.f32 2.0, %v2759_v56  ;;  %v698_v61 = vmul.f32 %v2759_v56, %v602_v44 }
 0xc46   :  { %v2212_v58 = vadd.f32 -1.0, %v696_v57 }
 0xc48   :  { %700 = vrot.lane.b32.xlu0 %v2212_v58, %s2831_s12 }
 0xcba   :  { %v701_v59 = vpop.permute.xlu0 %700 }
 0xcbb   :  { %v703_v60 = vmul.f32 %v2759_v56, %v701_v59 }
 0xcbd   :  { %705 = vrot.lane.b32.xlu1 %v703_v60, %s2832_s3 }
 0xd2f   :  { %v706_v62 = vpop.permute.xlu1 %705 }
 0xd30   :  { %v708_v19 = vadd.f32 %v706_v62, %v698_v61  ;;  %v1195_v61 = vld [vmem:[%s3302_s5] sm:$0xff]  ;;  %v1196_v62 = vld [vmem:[%s3302_s5 + $0x8] sm:$0xff] }
 0xd32   :  { %2760 = vtanh.f32 %v708_v19 }
 0xd3c   :  { %v2761_v63 = vpop.eup %2760 }
 0xd3d   :  { %711 = vrot.lane.b32.xlu0 %v2761_v63, %s2831_s12  ;;  %v1197_v63 = vld [vmem:[%s3302_s5 + $0x10] sm:$0xff] }
 0xdaf   :  { %v712_v0 = vpop.permute.xlu0 %711 }
 0xdb0   :  { %v714_v1 = vmul.f32 %v2759_v56, %v712_v0  ;;  %v1198_v0 = vld [vmem:[%s3302_s5 + $0x18] sm:$0xff] }
 0xdb2   :  { %716 = vrot.lane.b32.xlu1 %v714_v1, %s2832_s3  ;;  %v3097_v1 = vpack.c.bf16 %v1198_v0, %v1197_v63 }
 0xe24   :  { %v717_v2 = vpop.permute.xlu1 %716 }
 0xe25   :  { %720 = vst.msk [vmem:[#allocation3 + $0x20] sm:$0xff] %vm192_vm2, %v717_v2  ;;  %2457 = vmatmul.mubr.msk.f32.vlgmr.msra.gmra.mrb[10].mxu1 %vm192_vm2, %v717_v2 }
 0xe26   :  { %2657 = vmatpush3.bf16.msra.mxu1 %v2905_v8  ;;  %2478 = vmatprep.mubr.msk.f32.mxu1 %vm2829_vm1, %v2830_v16 }
 0xe27   :  { %2658 = vmatprep.subr.bf16.mxu1 %v2828_v10 }
 0xe2a   :  { %2660 = vmatpush3.bf16.msra.mxu1 %v2929_v15 }
 0xe2b   :  { %2669 = vmatprep.subr.bf16.mxu1 %v2828_v10 }
 0xe2c   :  { %v1043_v38 = vld [vmem:[#allocation3 + $0x20] sm:$0xff] }
 0xef8   :  { %v791_v4 = vpop.f32.mrb[10].mxu1 }
 0xef9   :  { %v795_v5 = vadd.f32 %v791_v4, %v166_v3  ;;  %v2458_v6 = vpop.f32.mrb[11].mxu1 }
 0xefa   :  { %v176_v6 = vadd.f32 %v2957_v22, %v2955_v21 }
 0xefb   :  { %v2214_v7 = vmul.f32 -1.442695, %v795_v5 }
 0xefd   :  { %2762 = vpow2.f32 %v2214_v7 }
 0xf07   :  { %v2763_v9 = vpop.eup %2762 }
 0xf08   :  { %v799_v11 = vadd.f32 1.0, %v2763_v9 }
 0xf0a   :  { %2764 = vrcp.f32 %v799_v11 }
 0xf14   :  { %v2765_v8 = vpop.eup %2764 }
 0xf15   :  { %v802_v12 = vmul.f32 2.0, %v2765_v8  ;;  %v804_v18 = vmul.f32 %v2765_v8, %v708_v19  ;;  %v3087_v19 = vpack.c.bf16 %v1196_v62, %v1195_v61 }
 0xf17   :  { %v2215_v13 = vadd.f32 -1.0, %v802_v12 }
 0xf19   :  { %806 = vrot.lane.b32.xlu0 %v2215_v13, %s2831_s12 }
 0xf8b   :  { %v807_v14 = vpop.permute.xlu0 %806 }
 0xf8c   :  { %v809_v15 = vmul.f32 %v2765_v8, %v807_v14 }
 0xf8e   :  { %811 = vrot.lane.b32.xlu1 %v809_v15, %s2832_s3 }
0x1000   :  { %v812_v20 = vpop.permute.xlu1 %811 }
0x1001   :  { %v814_v17 = vadd.f32 %v812_v20, %v804_v18 }
0x1003   :  { %2766 = vtanh.f32 %v814_v17 }
0x100d   :  { %v2767_v27 = vpop.eup %2766 }
0x100e   :  { %817 = vrot.lane.b32.xlu0 %v2767_v27, %s2831_s12 }
0x1080   :  { %v818_v28 = vpop.permute.xlu0 %817 }
0x1081   :  { %v820_v29 = vmul.f32 %v2765_v8, %v818_v28  ;;  %v3123_v8 = vld [vmem:[%s3303_s6] ss:$0 sm:$0xff] }
0x1083   :  { %822 = vrot.lane.b32.xlu1 %v820_v29, %s2832_s3 }
0x10f5   :  { %v823_v33 = vpop.permute.xlu1 %822 }
0x10f6   :  { %826 = vst.msk [vmem:[#allocation3 + $0x28] sm:$0xff] %vm192_vm2, %v823_v33  ;;  %2468 = vmatmul.mubr.msk.f32.vlgmr.msra.gmra.mrb[8].mxu0 %vm192_vm2, %v823_v33 }
0x10f7   :  { %2664 = vmatpush3.bf16.msra.mxu0 %v2661_v26  ;;  %2489 = vmatprep.mubr.msk.f32.mxu0 %vm192_vm2, %v1039_v34 }
0x10f8   :  { %2666 = vmatprep.subr.bf16.mxu0 %v2665_v32 }
0x10fb   :  { %2668 = vmatpush3.bf16.msra.mxu0 %v2665_v32 }
0x10fc   :  { %2681 = vmatprep.subr.bf16.mxu0 %v2828_v10 }
0x10fd   :  { %v1044_v39 = vld [vmem:[#allocation3 + $0x28] sm:$0xff] }
0x10fe   :  { %2490 = vmatmul.mubr.msk.f32.vlgmr.msra.gmra.mrb[10].mxu0 %vm192_vm2, %v1040_v35 }
0x10ff   :  { %2492 = vmatprep.mubr.msk.f32.mxu0 %vm192_vm2, %v1041_v36  ;;  %2683 = vmatpush3.bf16.msra.mxu0 %v3087_v19 }
0x1100   :  { %2684 = vmatprep.subr.bf16.mxu0 %v2828_v10 }
0x1102   :  { %2493 = vmatmul.mubr.msk.f32.gmra.mrb[12].mxu0 %vm192_vm2, %v1042_v37 }
0x1103   :  { %2495 = vmatprep.mubr.msk.f32.mxu0 %vm192_vm2, %v1043_v38  ;;  %2686 = vmatpush3.bf16.msra.mxu0 %v3097_v1 }
0x1104   :  { %2693 = vmatprep.subr.bf16.mxu0 %v2828_v10 }
0x1106   :  { %2496 = vmatmul.mubr.msk.f32.gmra.mrb[14].mxu0 %vm192_vm2, %v1044_v39 }
0x11c9   :  { %v897_v41 = vpop.f32.mrb[8].mxu0 }
0x11ca   :  { %v901_v42 = vadd.f32 %v897_v41, %v171_v40  ;;  %v2469_v43 = vpop.f32.mrb[9].mxu0 }
0x11cc   :  { %v2217_v44 = vmul.f32 -1.442695, %v901_v42 }
0x11ce   :  { %2768 = vpow2.f32 %v2217_v44 }
0x11d1   :  { %v3065_v45 = vpop.f32.mrb[10].mxu0 }
0x11d2   :  { %v1148_v46 = vpop.f32.mrb[11].mxu0 }
0x11d3   :  { %v1149_v12 = vadd.f32 %v3123_v8, %v1148_v46 }
0x11d5   :  { %v3067_v47 = vpop.f32.mrb[12].mxu0 }
0x11d6   :  { %v3069_v48 = vpop.f32.mrb[13].mxu0 }
0x11d8   :  { %v2769_v49 = vpop.eup %2768 }
0x11d9   :  { %v905_v50 = vadd.f32 1.0, %v2769_v49  ;;  %v3071_v51 = vpop.f32.mrb[14].mxu0 }
0x11da   :  { %v3073_v52 = vpop.f32.mrb[15].mxu0 }
0x11db   :  { %2770 = vrcp.f32 %v905_v50 }
0x11e5   :  { %v2771_v23 = vpop.eup %2770 }
0x11e6   :  { %v908_v53 = vmul.f32 2.0, %v2771_v23  ;;  %v910_v57 = vmul.f32 %v2771_v23, %v814_v17 }
0x11e8   :  { %v2218_v54 = vadd.f32 -1.0, %v908_v53 }
0x11ea   :  { %912 = vrot.lane.b32.xlu0 %v2218_v54, %s2831_s12 }
0x125c   :  { %v913_v55 = vpop.permute.xlu0 %912 }
0x125d   :  { %v915_v56 = vmul.f32 %v2771_v23, %v913_v55 }
0x125f   :  { %917 = vrot.lane.b32.xlu1 %v915_v56, %s2832_s3 }
0x12d1   :  { %v918_v58 = vpop.permute.xlu1 %917 }
0x12d2   :  { %v3077_v59 = vadd.f32 %v918_v58, %v910_v57 }
0x12d4   :  { %2772 = vtanh.f32 %v3077_v59 }
0x12de   :  { %v2773_v60 = vpop.eup %2772 }
0x12df   :  { %923 = vrot.lane.b32.xlu0 %v2773_v60, %s2831_s12 }
0x1351   :  { %v924_v2 = vpop.permute.xlu0 %923 }
0x1352   :  { %v926_v3 = vmul.f32 %v2771_v23, %v924_v2  ;;  %v1154_v23 = vadd.f32 %v3065_v45, %v3123_v8 }
0x1354   :  { %928 = vrot.lane.b32.xlu1 %v926_v3, %s2832_s3 }
0x13c6   :  { %v929_v4 = vpop.permute.xlu1 %928 }
0x13c7   :  { %932 = vst.msk [vmem:[#allocation3 + $0x30] sm:$0xff] %vm192_vm2, %v929_v4  ;;  %2479 = vmatmul.mubr.msk.f32.vlgmr.msra.gmra.mrb[12].mxu1 %vm192_vm2, %v929_v4 }
0x13c8   :  { %2671 = vmatpush3.bf16.msra.mxu1 %v3087_v19  ;;  %2509 = vmatprep.mubr.msk.f32.mxu1 %vm2829_vm1, %v2830_v16 }
0x13c9   :  { %2672 = vmatprep.subr.bf16.mxu1 %v2828_v10 }
0x13cc   :  { %2674 = vmatpush3.bf16.msra.mxu1 %v3097_v1 }
0x13cd   :  { %2675 = vmatprep.subr.bf16.mxu1 %v2828_v10 }
0x13ce   :  { %v1045_v5 = vld [vmem:[#allocation3 + $0x30] sm:$0xff] }
0x13cf   :  { %2510 = vmatmul.mubr.f32.vlgmr.msra.gmra.mrb[14].mxu1 %v2830_v16  ;;  %2498 = vmatprep.mubr.msk.f32.mxu0 %vm192_vm2, %v1045_v5 }
0x13d0   :  { %2677 = vmatpush3.bf16.msra.mxu1 %v3087_v19  ;;  %2520 = vmatprep.mubr.msk.f32.mxu1 %vm2829_vm1, %v2830_v16 }
0x13d1   :  { %2678 = vmatprep.subr.bf16.mxu1 %v2828_v10 }
0x13d4   :  { %2680 = vmatpush3.bf16.msra.mxu1 %v3097_v1 }
0x13d5   :  { %2687 = vmatprep.subr.bf16.mxu1 %v2828_v10 }
0x149a   :  { %v1003_v7 = vpop.f32.mrb[12].mxu1 }
0x149b   :  { %v1007_v9 = vadd.f32 %v1003_v7, %v176_v6  ;;  %v2480_v11 = vpop.f32.mrb[13].mxu1 }
0x149d   :  { %v2220_v27 = vmul.f32 -1.442695, %v1007_v9 }
0x14a2   :  { %v1266_v13 = vpop.f32.mrb[14].mxu1 }
0x14a3   :  { %v1270_v14 = vadd.f32 %v1266_v13, %v1149_v12  ;;  %v2511_v15 = vpop.f32.mrb[15].mxu1  ;;  %v1159_v13 = vadd.f32 %v3123_v8, %v3069_v48 }
0x14a5   :  { %v2231_v18 = vmul.f32 -1.442695, %v1270_v14 }
0x14a7   :  { %2774 = vpow2.f32 %v2231_v18 }
0x14b1   :  { %v2775_v20 = vpop.eup %2774 }
0x14b2   :  { %v1274_v17 = vadd.f32 1.0, %v2775_v20 }
0x14b4   :  { %2776 = vrcp.f32 %v1274_v17 }
0x14b5   :  { %2778 = vpow2.f32 %v2220_v27 }
0x14be   :  { %v2777_v24 = vpop.eup %2776 }
0x14bf   :  { %v1277_v21 = vmul.f32 2.0, %v2777_v24  ;;  %v2779_v28 = vpop.eup %2778  ;;  %v1279_v30 = vmul.f32 0.0, %v2777_v24 }
0x14c0   :  { %v1011_v29 = vadd.f32 1.0, %v2779_v28 }
0x14c1   :  { %v2232_v22 = vadd.f32 -1.0, %v1277_v21 }
0x14c2   :  { %2780 = vrcp.f32 %v1011_v29 }
0x14c3   :  { %1281 = vrot.lane.b32.xlu0 %v2232_v22, %s2831_s12 }
0x14cc   :  { %v2781_v33 = vpop.eup %2780 }
0x14cd   :  { %v1014_v34 = vmul.f32 2.0, %v2781_v33  ;;  %v1016_v42 = vmul.f32 %v2781_v33, %v3077_v59 }
0x14cf   :  { %v2221_v36 = vadd.f32 -1.0, %v1014_v34  ;;  %v1164_v34 = vadd.f32 %v3067_v47, %v3123_v8 }
0x1535   :  { %v1282_v25 = vpop.permute.xlu0 %1281 }
0x1536   :  { %v1284_v26 = vmul.f32 %v2777_v24, %v1282_v25 }
0x1538   :  { %1286 = vrot.lane.b32.xlu1 %v1284_v26, %s2832_s3 }
0x15aa   :  { %v1287_v31 = vpop.permute.xlu1 %1286 }
0x15ab   :  { %v1289_v32 = vadd.f32 %v1287_v31, %v1279_v30 }
0x15ad   :  { %2782 = vtanh.f32 %v1289_v32 }
0x15b7   :  { %v2783_v35 = vpop.eup %2782 }
0x15b8   :  { %1292 = vrot.lane.b32.xlu0 %v2783_v35, %s2831_s12 }
0x15bc   :  { %1018 = vrot.lane.b32.xlu0 %v2221_v36, %s2831_s12 }
0x162a   :  { %v1293_v37 = vpop.permute.xlu0 %1292 }
0x162b   :  { %v1295_v38 = vmul.f32 %v2777_v24, %v1293_v37 }
0x162d   :  { %1297 = vrot.lane.b32.xlu1 %v1295_v38, %s2832_s3 }
0x162e   :  { %v1019_v39 = vpop.permute.xlu0 %1018 }
0x162f   :  { %v1021_v40 = vmul.f32 %v2781_v33, %v1019_v39 }
0x1631   :  { %1023 = vrot.lane.b32.xlu0 %v1021_v40, %s2832_s3 }
0x169f   :  { %v1298_v41 = vpop.permute.xlu1 %1297 }
0x16a0   :  { %1300 = vst.msk [vmem:[#allocation3] sm:$0xff] %vm192_vm2, %v1298_v41  ;;  %2521 = vmatmul.mubr.msk.f32.vlgmr.msra.gmra.mrb[16].mxu1 %vm192_vm2, %v1298_v41 }
0x16a1   :  { %2689 = vmatpush3.bf16.msra.mxu1 %v3087_v19  ;;  %2542 = vmatprep.mubr.msk.f32.mxu1 %vm2829_vm1, %v2830_v16 }
0x16a2   :  { %2690 = vmatprep.subr.bf16.mxu1 %v2828_v10 }
0x16a3   :  { %v1024_v43 = vpop.permute.xlu0 %1023 }
0x16a4   :  { %v1026_v44 = vadd.f32 %v1024_v43, %v1016_v42 }
0x16a5   :  { %2692 = vmatpush3.bf16.msra.mxu1 %v3097_v1 }
0x16a6   :  { %2784 = vtanh.f32 %v1026_v44  ;;  %2699 = vmatprep.subr.bf16.mxu1 %v2828_v10 }
0x16b0   :  { %v2785_v46 = vpop.eup %2784 }
0x16b1   :  { %1029 = vrot.lane.b32.xlu0 %v2785_v46, %s2831_s12 }
0x1723   :  { %v1030_v49 = vpop.permute.xlu0 %1029 }
0x1724   :  { %v1032_v50 = vmul.f32 %v2781_v33, %v1030_v49 }
0x1726   :  { %1034 = vrot.lane.b32.xlu0 %v1032_v50, %s2832_s3 }
0x1773   :  { %v1370_v53 = vpop.f32.mrb[16].mxu1 }
0x1774   :  { %v1374_v54 = vadd.f32 %v1370_v53, %v1154_v23  ;;  %v2522_v55 = vpop.f32.mrb[17].mxu1 }
0x1776   :  { %v2234_v56 = vmul.f32 -1.442695, %v1374_v54 }
0x1778   :  { %2786 = vpow2.f32 %v2234_v56  ;;  %v1169_v56 = vadd.f32 %v3123_v8, %v3073_v52 }
0x1782   :  { %v2787_v57 = vpop.eup %2786 }
0x1783   :  { %v1378_v58 = vadd.f32 1.0, %v2787_v57 }
0x1785   :  { %2788 = vrcp.f32 %v1378_v58 }
0x178f   :  { %v2789_v59 = vpop.eup %2788 }
0x1790   :  { %v1381_v60 = vmul.f32 2.0, %v2789_v59  ;;  %v1383_v4 = vmul.f32 %v2789_v59, %v1289_v32 }
0x1792   :  { %v2235_v61 = vadd.f32 -1.0, %v1381_v60 }
0x1794   :  { %1385 = vrot.lane.b32.xlu1 %v2235_v61, %s2831_s12 }
0x1798   :  { %v1035_v62 = vpop.permute.xlu0 %1034 }
0x1799   :  { %1038 = vst.msk [vmem:[#allocation3 + $0x38] sm:$0xff] %vm192_vm2, %v1035_v62 }
0x17a0   :  { %v1046_v63 = vld [vmem:[#allocation3 + $0x38] sm:$0xff] }
0x17a1   :  { %2499 = vmatmul.mubr.msk.f32.gmra.mrb[16].mxu0 %vm192_vm2, %v1046_v63 }
0x17a2   :  { %2531 = vmatprep.mubr.msk.f32.mxu0 %vm2829_vm1, %v2830_v16 }
0x1806   :  { %v1386_v45 = vpop.permute.xlu1 %1385 }
0x1807   :  { %v1388_v0 = vmul.f32 %v2789_v59, %v1386_v45 }
0x1809   :  { %1390 = vrot.lane.b32.xlu1 %v1388_v0, %s2832_s3 }
0x1874   :  { %v3151_v2 = vpop.f32.mrb[16].mxu0 }
0x1875   :  { %v3153_v3 = vpop.f32.mrb[17].mxu0 }
0x187b   :  { %v1391_v5 = vpop.permute.xlu1 %1390 }
0x187c   :  { %v1393_v6 = vadd.f32 %v1391_v5, %v1383_v4 }
0x187e   :  { %2790 = vtanh.f32 %v1393_v6 }
0x1888   :  { %v2791_v7 = vpop.eup %2790 }
0x1889   :  { %1396 = vrot.lane.b32.xlu1 %v2791_v7, %s2831_s12 }
0x18fb   :  { %v1397_v9 = vpop.permute.xlu1 %1396 }
0x18fc   :  { %v1399_v11 = vmul.f32 %v2789_v59, %v1397_v9 }
0x18fe   :  { %1401 = vrot.lane.b32.xlu1 %v1399_v11, %s2832_s3 }
0x1970   :  { %v1402_v12 = vpop.permute.xlu1 %1401 }
0x1971   :  { %1404 = vst.msk [vmem:[#allocation3 + $0x8] sm:$0xff] %vm192_vm2, %v1402_v12  ;;  %2532 = vmatmul.mubr.msk.f32.vlgmr.msra.gmra.mrb[18].mxu0 %vm192_vm2, %v1402_v12 }
0x1972   :  { %2695 = vmatpush3.bf16.msra.mxu0 %v3087_v19  ;;  %2553 = vmatprep.mubr.msk.f32.mxu0 %vm2829_vm1, %v2830_v16 }
0x1973   :  { %2696 = vmatprep.subr.bf16.mxu0 %v2828_v10 }
0x1976   :  { %2698 = vmatpush3.bf16.msra.mxu0 %v3097_v1 }
0x1977   :  { %2705 = vmatprep.subr.bf16.mxu0 %v2828_v10 }
0x1a44   :  { %v1474_v14 = vpop.f32.mrb[18].mxu0 }
0x1a45   :  { %v1478_v15 = vadd.f32 %v1474_v14, %v1159_v13  ;;  %v2533_v18 = vpop.f32.mrb[19].mxu0  ;;  %v1174_v14 = vadd.f32 %v3071_v51, %v3123_v8 }
0x1a47   :  { %v2237_v20 = vmul.f32 -1.442695, %v1478_v15 }
0x1a49   :  { %2792 = vpow2.f32 %v2237_v20 }
0x1a53   :  { %v2793_v17 = vpop.eup %2792 }
0x1a54   :  { %v1482_v24 = vadd.f32 1.0, %v2793_v17 }
0x1a56   :  { %2794 = vrcp.f32 %v1482_v24 }
0x1a60   :  { %v2795_v21 = vpop.eup %2794 }
0x1a61   :  { %v1485_v22 = vmul.f32 2.0, %v2795_v21  ;;  %v1487_v28 = vmul.f32 %v2795_v21, %v1393_v6 }
0x1a63   :  { %v2238_v25 = vadd.f32 -1.0, %v1485_v22 }
0x1a65   :  { %1489 = vrot.lane.b32.xlu0 %v2238_v25, %s2831_s12 }
0x1ad7   :  { %v1490_v26 = vpop.permute.xlu0 %1489 }
0x1ad8   :  { %v1492_v27 = vmul.f32 %v2795_v21, %v1490_v26 }
0x1ada   :  { %1494 = vrot.lane.b32.xlu1 %v1492_v27, %s2832_s3  ;;  %v2037_v27 = vld [vmem:[%s3304_s7] sm:$0xff] }
0x1b4c   :  { %v1495_v29 = vpop.permute.xlu1 %1494 }
0x1b4d   :  { %v1497_v48 = vadd.f32 %v1495_v29, %v1487_v28  ;;  %v2038_v28 = vld [vmem:[%s3304_s7 + $0x8] sm:$0xff] }
0x1b4e   :  { %v2717_v29 = vpack.c.bf16 %v2038_v28, %v2037_v27 }
0x1b4f   :  { %2796 = vtanh.f32 %v1497_v48 }
0x1b59   :  { %v2797_v30 = vpop.eup %2796 }
0x1b5a   :  { %1500 = vrot.lane.b32.xlu0 %v2797_v30, %s2831_s12 }
0x1bcc   :  { %v1501_v31 = vpop.permute.xlu0 %1500 }
0x1bcd   :  { %v1503_v32 = vmul.f32 %v2795_v21, %v1501_v31 }
0x1bcf   :  { %1505 = vrot.lane.b32.xlu1 %v1503_v32, %s2832_s3  ;;  %v2039_v32 = vld [vmem:[%s3304_s7 + $0x10] sm:$0xff] }
0x1c41   :  { %v1506_v33 = vpop.permute.xlu1 %1505 }
0x1c42   :  { %1508 = vst.msk [vmem:[#allocation3 + $0x10] sm:$0xff] %vm192_vm2, %v1506_v33  ;;  %2543 = vmatmul.mubr.msk.f32.vlgmr.msra.gmra.mrb[18].mxu1 %vm192_vm2, %v1506_v33  ;;  %v2040_v33 = vld [vmem:[%s3304_s7 + $0x18] sm:$0xff] }
0x1c43   :  { %2701 = vmatpush3.bf16.msra.mxu1 %v3087_v19  ;;  %2564 = vmatprep.mubr.msk.f32.mxu1 %vm2829_vm1, %v2830_v16 }
0x1c44   :  { %2702 = vmatprep.subr.bf16.mxu1 %v2828_v10 }
0x1c47   :  { %2704 = vmatpush3.bf16.msra.mxu1 %v3097_v1 }
0x1c48   :  { %2711 = vmatprep.subr.bf16.mxu1 %v2828_v10 }
0x1d15   :  { %v1578_v35 = vpop.f32.mrb[18].mxu1 }
0x1d16   :  { %v1582_v36 = vadd.f32 %v1578_v35, %v1164_v34  ;;  %v2544_v37 = vpop.f32.mrb[19].mxu1  ;;  %v2721_v34 = vpack.c.bf16 %v2040_v33, %v2039_v32 }
0x1d17   :  { %v2030_v37 = vld [vmem:[#allocation3 + $0x8] sm:$0xff] }
0x1d18   :  { %v2240_v38 = vmul.f32 -1.442695, %v1582_v36  ;;  %v2029_v36 = vld [vmem:[#allocation3] sm:$0xff] }
0x1d1a   :  { %2798 = vpow2.f32 %v2240_v38  ;;  %v2031_v38 = vld [vmem:[#allocation3 + $0x10] sm:$0xff] }
0x1d24   :  { %v2799_v39 = vpop.eup %2798 }
0x1d25   :  { %v1586_v40 = vadd.f32 1.0, %v2799_v39 }
0x1d27   :  { %2800 = vrcp.f32 %v1586_v40 }
0x1d31   :  { %v2801_v41 = vpop.eup %2800 }
0x1d32   :  { %v1589_v42 = vmul.f32 2.0, %v2801_v41  ;;  %v1591_v49 = vmul.f32 %v2801_v41, %v1497_v48 }
0x1d34   :  { %v2241_v43 = vadd.f32 -1.0, %v1589_v42  ;;  %v1179_v42 = vadd.f32 %v3123_v8, %v3153_v3 }
0x1d36   :  { %1593 = vrot.lane.b32.xlu0 %v2241_v43, %s2831_s12 }
0x1da8   :  { %v1594_v44 = vpop.permute.xlu0 %1593 }
0x1da9   :  { %v1596_v46 = vmul.f32 %v2801_v41, %v1594_v44 }
0x1dab   :  { %1598 = vrot.lane.b32.xlu1 %v1596_v46, %s2832_s3 }
0x1e1d   :  { %v1599_v50 = vpop.permute.xlu1 %1598 }
0x1e1e   :  { %v1601_v47 = vadd.f32 %v1599_v50, %v1591_v49  ;;  %v3239_v50 = vld [vmem:[%s3305_s8] ss:$0 sm:$0xff] }
0x1e20   :  { %2802 = vtanh.f32 %v1601_v47 }
0x1e2a   :  { %v2803_v23 = vpop.eup %2802 }
0x1e2b   :  { %1604 = vrot.lane.b32.xlu0 %v2803_v23, %s2831_s12 }
0x1e9d   :  { %v1605_v53 = vpop.permute.xlu0 %1604 }
0x1e9e   :  { %v1607_v54 = vmul.f32 %v2801_v41, %v1605_v53 }
0x1ea0   :  { %1609 = vrot.lane.b32.xlu1 %v1607_v54, %s2832_s3 }
0x1f12   :  { %v1610_v55 = vpop.permute.xlu1 %1609 }
0x1f13   :  { %1612 = vst.msk [vmem:[#allocation3 + $0x18] sm:$0xff] %vm192_vm2, %v1610_v55  ;;  %2554 = vmatmul.mubr.msk.f32.vlgmr.msra.gmra.mrb[20].mxu0 %vm192_vm2, %v1610_v55 }
0x1f14   :  { %2707 = vmatpush3.bf16.msra.mxu0 %v3087_v19  ;;  %2575 = vmatprep.mubr.msk.f32.mxu0 %vm2829_vm1, %v2830_v16 }
0x1f15   :  { %2708 = vmatprep.subr.bf16.mxu0 %v2828_v10 }
0x1f18   :  { %2710 = vmatpush3.bf16.msra.mxu0 %v3097_v1 }
0x1f19   :  { %2718 = vmatprep.subr.bf16.mxu0 %v2717_v29 }
0x1f1a   :  { %v2032_v39 = vld [vmem:[#allocation3 + $0x18] sm:$0xff] }
0x1fe6   :  { %v1682_v57 = vpop.f32.mrb[20].mxu0 }
0x1fe7   :  { %v1686_v58 = vadd.f32 %v1682_v57, %v1169_v56  ;;  %v2555_v59 = vpop.f32.mrb[21].mxu0 }
0x1fe9   :  { %v2243_v60 = vmul.f32 -1.442695, %v1686_v58 }
0x1feb   :  { %2804 = vpow2.f32 %v2243_v60 }
0x1ff5   :  { %v2805_v61 = vpop.eup %2804 }
0x1ff6   :  { %v1690_v62 = vadd.f32 1.0, %v2805_v61 }
0x1ff8   :  { %2806 = vrcp.f32 %v1690_v62 }
0x2002   :  { %v2807_v63 = vpop.eup %2806 }
0x2003   :  { %v1693_v45 = vmul.f32 2.0, %v2807_v63  ;;  %v1695_v6 = vmul.f32 %v2807_v63, %v1601_v47 }
0x2005   :  { %v2244_v0 = vadd.f32 -1.0, %v1693_v45 }
0x2007   :  { %1697 = vrot.lane.b32.xlu0 %v2244_v0, %s2831_s12 }
0x2079   :  { %v1698_v4 = vpop.permute.xlu0 %1697 }
0x207a   :  { %v1700_v5 = vmul.f32 %v2807_v63, %v1698_v4 }
0x207c   :  { %1702 = vrot.lane.b32.xlu1 %v1700_v5, %s2832_s3 }
0x20ee   :  { %v1703_v7 = vpop.permute.xlu1 %1702 }
0x20ef   :  { %v1705_v52 = vadd.f32 %v1703_v7, %v1695_v6 }
0x20f1   :  { %2808 = vtanh.f32 %v1705_v52 }
0x20fb   :  { %v2809_v9 = vpop.eup %2808 }
0x20fc   :  { %1708 = vrot.lane.b32.xlu0 %v2809_v9, %s2831_s12 }
0x216e   :  { %v1709_v11 = vpop.permute.xlu0 %1708 }
0x216f   :  { %v1711_v12 = vmul.f32 %v2807_v63, %v1709_v11 }
0x2171   :  { %1713 = vrot.lane.b32.xlu1 %v1711_v12, %s2832_s3 }
0x21e3   :  { %v1714_v13 = vpop.permute.xlu1 %1713 }
0x21e4   :  { %1716 = vst.msk [vmem:[#allocation3 + $0x20] sm:$0xff] %vm192_vm2, %v1714_v13  ;;  %2565 = vmatmul.mubr.msk.f32.vlgmr.msra.gmra.mrb[20].mxu1 %vm192_vm2, %v1714_v13 }
0x21e5   :  { %2713 = vmatpush3.bf16.msra.mxu1 %v3087_v19  ;;  %2586 = vmatprep.mubr.msk.f32.mxu1 %vm2829_vm1, %v2830_v16 }
0x21e6   :  { %2714 = vmatprep.subr.bf16.mxu1 %v2828_v10 }
0x21e9   :  { %2716 = vmatpush3.bf16.msra.mxu1 %v3097_v1 }
0x21eb   :  { %v2033_v40 = vld [vmem:[#allocation3 + $0x20] sm:$0xff] }
0x22b7   :  { %v1786_v15 = vpop.f32.mrb[20].mxu1 }
0x22b8   :  { %v1790_v18 = vadd.f32 %v1786_v15, %v1174_v14  ;;  %v2566_v20 = vpop.f32.mrb[21].mxu1 }
0x22ba   :  { %v2246_v17 = vmul.f32 -1.442695, %v1790_v18  ;;  %v1184_v18 = vadd.f32 %v3151_v2, %v3123_v8 }
0x22bc   :  { %2810 = vpow2.f32 %v2246_v17 }
0x22c6   :  { %v2811_v24 = vpop.eup %2810 }
0x22c7   :  { %v1794_v21 = vadd.f32 1.0, %v2811_v24 }
0x22c9   :  { %2812 = vrcp.f32 %v1794_v21 }
0x22d3   :  { %v2813_v22 = vpop.eup %2812 }
0x22d4   :  { %v1797_v19 = vmul.f32 2.0, %v2813_v22  ;;  %v1799_v1 = vmul.f32 %v2813_v22, %v1705_v52 }
0x22d6   :  { %v2247_v25 = vadd.f32 -1.0, %v1797_v19 }
0x22d8   :  { %1801 = vrot.lane.b32.xlu0 %v2247_v25, %s2831_s12 }
0x234a   :  { %v1802_v16 = vpop.permute.xlu0 %1801 }
0x234b   :  { %v1804_v10 = vmul.f32 %v2813_v22, %v1802_v16 }
0x234d   :  { %1806 = vrot.lane.b32.xlu1 %v1804_v10, %s2832_s3 }
0x23bf   :  { %v1807_v26 = vpop.permute.xlu1 %1806 }
0x23c0   :  { %v3209_v51 = vadd.f32 %v1807_v26, %v1799_v1 }
0x23c2   :  { %2814 = vtanh.f32 %v3209_v51 }
0x23cc   :  { %v2815_v48 = vpop.eup %2814 }
0x23cd   :  { %1812 = vrot.lane.b32.xlu0 %v2815_v48, %s2831_s12 }
0x243f   :  { %v1813_v30 = vpop.permute.xlu0 %1812 }
0x2440   :  { %v1815_v31 = vmul.f32 %v2813_v22, %v1813_v30 }
0x2442   :  { %1817 = vrot.lane.b32.xlu1 %v1815_v31, %s2832_s3 }
0x24b4   :  { %v1818_v35 = vpop.permute.xlu1 %1817 }
0x24b5   :  { %1820 = vst.msk [vmem:[#allocation3 + $0x28] sm:$0xff] %vm192_vm2, %v1818_v35  ;;  %2576 = vmatmul.mubr.msk.f32.vlgmr.msra.gmra.mrb[22].mxu0 %vm192_vm2, %v1818_v35 }
0x24b6   :  { %2720 = vmatpush3.bf16.msra.mxu0 %v2717_v29  ;;  %2597 = vmatprep.mubr.msk.f32.mxu0 %vm192_vm2, %v2029_v36 }
0x24b7   :  { %2722 = vmatprep.subr.bf16.mxu0 %v2721_v34 }
0x24ba   :  { %2724 = vmatpush3.bf16.msra.mxu0 %v2721_v34 }
0x24bc   :  { %v2034_v41 = vld [vmem:[#allocation3 + $0x28] sm:$0xff] }
0x24bd   :  { %2598 = vmatmul.mubr.msk.f32.vlgmr.msra.gmra.mrb[24].mxu0 %vm192_vm2, %v2030_v37 }
0x24be   :  { %2600 = vmatprep.mubr.msk.f32.mxu0 %vm192_vm2, %v2031_v38 }
0x24c1   :  { %2601 = vmatmul.mubr.msk.f32.gmra.mrb[26].mxu0 %vm192_vm2, %v2032_v39 }
0x24c2   :  { %2603 = vmatprep.mubr.msk.f32.mxu0 %vm192_vm2, %v2033_v40 }
0x24c5   :  { %2604 = vmatmul.mubr.msk.f32.gmra.mrb[28].mxu0 %vm192_vm2, %v2034_v41 }
0x2588   :  { %v1890_v43 = vpop.f32.mrb[22].mxu0 }
0x2589   :  { %v1894_v44 = vadd.f32 %v1890_v43, %v1179_v42  ;;  %v2577_v46 = vpop.f32.mrb[23].mxu0 }
0x258b   :  { %v2249_v49 = vmul.f32 -1.442695, %v1894_v44 }
0x258d   :  { %2816 = vpow2.f32 %v2249_v49 }
0x2590   :  { %v2599_v47 = vpop.f32.mrb[24].mxu0 }
0x2591   :  { %v2144_v23 = vadd.f32 %v2599_v47, %v3239_v50  ;;  %v2138_v53 = vpop.f32.mrb[25].mxu0 }
0x2592   :  { %v2139_v54 = vadd.f32 %v3239_v50, %v2138_v53 }
0x2593   :  { %2179 = vst.msk [vmem:[%s3306_s9 + $0x8] sm:$0xff] %vm2177_vm3, %v2144_v23 }
0x2594   :  { %2178 = vst.msk [vmem:[%s3306_s9] sm:$0xff] %vm2177_vm3, %v2139_v54  ;;  %v2602_v3 = vpop.f32.mrb[26].mxu0 }
0x2595   :  { %v2154_v55 = vadd.f32 %v2602_v3, %v3239_v50  ;;  %v2148_v56 = vpop.f32.mrb[27].mxu0 }
0x2596   :  { %v2149_v57 = vadd.f32 %v3239_v50, %v2148_v56 }
0x2597   :  { %v2817_v58 = vpop.eup %2816  ;;  %2181 = vst.msk [vmem:[%s3306_s9 + $0x18] sm:$0xff] %vm2177_vm3, %v2154_v55 }
0x2598   :  { %v1898_v59 = vadd.f32 1.0, %v2817_v58  ;;  %2180 = vst.msk [vmem:[%s3306_s9 + $0x10] sm:$0xff] %vm2177_vm3, %v2149_v57  ;;  %v2605_v60 = vpop.f32.mrb[28].mxu0 }
0x2599   :  { %v2164_v61 = vadd.f32 %v2605_v60, %v3239_v50  ;;  %v2158_v62 = vpop.f32.mrb[29].mxu0 }
0x259a   :  { %2818 = vrcp.f32 %v1898_v59  ;;  %v2159_v63 = vadd.f32 %v3239_v50, %v2158_v62 }
0x259b   :  { %2183 = vst.msk [vmem:[%s3306_s9 + $0x28] sm:$0xff] %vm2177_vm3, %v2164_v61 }
0x259c   :  { %2182 = vst.msk [vmem:[%s3306_s9 + $0x20] sm:$0xff] %vm2177_vm3, %v2159_v63 }
0x25a4   :  { %v2819_v45 = vpop.eup %2818 }
0x25a5   :  { %v1901_v0 = vmul.f32 2.0, %v2819_v45  ;;  %v1903_v7 = vmul.f32 %v2819_v45, %v3209_v51 }
0x25a7   :  { %v2250_v4 = vadd.f32 -1.0, %v1901_v0 }
0x25a9   :  { %1905 = vrot.lane.b32.xlu0 %v2250_v4, %s2831_s12 }
0x261b   :  { %v1906_v5 = vpop.permute.xlu0 %1905 }
0x261c   :  { %v1908_v6 = vmul.f32 %v2819_v45, %v1906_v5 }
0x261e   :  { %1910 = vrot.lane.b32.xlu1 %v1908_v6, %s2832_s3 }
0x2690   :  { %v1911_v52 = vpop.permute.xlu1 %1910 }
0x2691   :  { %v1913_v9 = vadd.f32 %v1911_v52, %v1903_v7 }
0x2693   :  { %2820 = vtanh.f32 %v1913_v9 }
0x269d   :  { %v2821_v11 = vpop.eup %2820 }
0x269e   :  { %1916 = vrot.lane.b32.xlu0 %v2821_v11, %s2831_s12 }
0x2710   :  { %v1917_v12 = vpop.permute.xlu0 %1916 }
0x2711   :  { %v1919_v13 = vmul.f32 %v2819_v45, %v1917_v12 }
0x2713   :  { %1921 = vrot.lane.b32.xlu1 %v1919_v13, %s2832_s3 }
0x2785   :  { %v1922_v14 = vpop.permute.xlu1 %1921 }
0x2786   :  { %1924 = vst.msk [vmem:[#allocation3 + $0x30] sm:$0xff] %vm192_vm2, %v1922_v14  ;;  %2587 = vmatmul.mubr.msk.f32.vlgmr.msra.gmra.mrb[22].mxu1 %vm192_vm2, %v1922_v14 }
0x278d   :  { %v2035_v15 = vld [vmem:[#allocation3 + $0x30] sm:$0xff] }
0x278e   :  { %2606 = vmatprep.mubr.msk.f32.mxu0 %vm192_vm2, %v2035_v15 }
0x2859   :  { %v1994_v20 = vpop.f32.mrb[22].mxu1 }
0x285a   :  { %v1998_v17 = vadd.f32 %v1994_v20, %v1184_v18  ;;  %v2588_v24 = vpop.f32.mrb[23].mxu1 }
0x285c   :  { %v2252_v21 = vmul.f32 -1.442695, %v1998_v17 }
0x285e   :  { %2822 = vpow2.f32 %v2252_v21 }
0x2868   :  { %v2823_v22 = vpop.eup %2822 }
0x2869   :  { %v2002_v19 = vadd.f32 1.0, %v2823_v22 }
0x286b   :  { %2824 = vrcp.f32 %v2002_v19 }
0x2875   :  { %v2825_v25 = vpop.eup %2824 }
0x2876   :  { %v2005_v16 = vmul.f32 2.0, %v2825_v25  ;;  %v2007_v51 = vmul.f32 %v2825_v25, %v1913_v9 }
0x2878   :  { %v2253_v10 = vadd.f32 -1.0, %v2005_v16 }
0x287a   :  { %2009 = vrot.lane.b32.xlu0 %v2253_v10, %s2831_s12 }
0x28ec   :  { %v2010_v1 = vpop.permute.xlu0 %2009 }
0x28ed   :  { %v2012_v26 = vmul.f32 %v2825_v25, %v2010_v1 }
0x28ef   :  { %2014 = vrot.lane.b32.xlu1 %v2012_v26, %s2832_s3 }
0x2961   :  { %v2015_v27 = vpop.permute.xlu1 %2014 }
0x2962   :  { %v2017_v8 = vadd.f32 %v2015_v27, %v2007_v51 }
0x2964   :  { %2826 = vtanh.f32 %v2017_v8 }
0x296e   :  { %v2827_v2 = vpop.eup %2826 }
0x296f   :  { %2020 = vrot.lane.b32.xlu0 %v2827_v2, %s2831_s12 }
0x29e1   :  { %v2021_v28 = vpop.permute.xlu0 %2020 }
0x29e2   :  { %v2023_v29 = vmul.f32 %v2825_v25, %v2021_v28 }
0x29e4   :  { %2025 = vrot.lane.b32.xlu1 %v2023_v29, %s2832_s3 }
0x2a56   :  { %v2026_v48 = vpop.permute.xlu1 %2025 }
0x2a57   :  { %2028 = vst.msk [vmem:[#allocation3 + $0x38] sm:$0xff] %vm192_vm2, %v2026_v48 }
0x2a5e   :  { %v2036_v30 = vld [vmem:[#allocation3 + $0x38] sm:$0xff] }
0x2a5f   :  { %2607 = vmatmul.mubr.msk.f32.gmra.mrb[30].mxu0 %vm192_vm2, %v2036_v30 }
0x2b32   :  { %v2608_v31 = vpop.f32.mrb[30].mxu0 }
0x2b33   :  { %v2174_v32 = vadd.f32 %v2608_v31, %v3239_v50  ;;  %v2168_v33 = vpop.f32.mrb[31].mxu0 }
0x2b34   :  { %v2169_v34 = vadd.f32 %v3239_v50, %v2168_v33 }
0x2b35   :  { %2185 = vst.msk [vmem:[%s3306_s9 + $0x38] sm:$0xff] %vm2177_vm3, %v2174_v32 }
0x2b36   :  { %2184 = vst.msk [vmem:[%s3306_s9 + $0x30] sm:$0xff] %vm2177_vm3, %v2169_v34 }

</bundles_post_ra>
